<compile_context>
chip_gen: v5e
topology: v5e:2x2
jax: 0.10.0
libtpu: 0.0.40
codegen_flags: <defaults>
</compile_context>

<pallas_src>
import functools

import jax
import jax.numpy as jnp
from jax import lax
from jax.experimental import pallas as pl
from jax.experimental.pallas import tpu as pltpu


# ----------------------------- helpers -----------------------------
def _round_up(x, m):
    return (x + m - 1) // m * m


def _pick_tile(dim, preferred):
    for t in preferred:
        if dim % t == 0:
            return t
    return dim  # full extent (always a legal block size)


def _vmem_limit_bytes():
    # Generation-aware scoped-VMEM budget: ~75% of physical, capped at 96 MiB
    # (-> ~96 MiB on v5e/v6e with 128 MiB physical, ~48 MiB on v7x with 64 MiB).
    try:
        cap = pltpu.get_tpu_info().vmem_capacity_bytes
        return int(min(cap * 3 // 4, 96 * 1024 * 1024))
    except Exception:
        return 32 * 1024 * 1024


# ----------------------------- base_model kernel -----------------------------
def _base_kernel(x_ref, w_ref, b_ref, o_ref, acc_ref):
    # x_ref: (tm, tk) f32 activation tile (cast to bf16 in-kernel -> x is read from HBM once,
    #        4 B/elem, no separate XLA cast pass).  w_ref: (tk, C) bf16 pool-folded weight tile.
    @pl.when(pl.program_id(1) == 0)
    def _init():
        acc_ref[...] = jnp.zeros_like(acc_ref)

    acc_ref[...] += jnp.dot(x_ref[...].astype(jnp.bfloat16), w_ref[...],
                            preferred_element_type=jnp.float32)

    @pl.when(pl.program_id(1) == pl.num_programs(1) - 1)
    def _finalize():
        o_ref[...] = acc_ref[...] + b_ref[...]


def base_model(x_nchw, w, b):
    """Global average pool over (H, W) followed by Linear(Cin -> C), as one K-tiled GEMM."""
    N, Cin, H, W = x_nchw.shape
    C = w.shape[1]
    K = Cin * H * W

    # Fold the average pool into the GEMM weight: feat[n,c] = sum_{cin,hw} x[n,cin,hw] * w[cin,c]/HW
    x_flat = x_nchw.reshape(N, K)                                           # f32 (no wrapper cast)
    w_big = jnp.repeat(w / float(H * W), H * W, axis=0).astype(jnp.bfloat16)  # (K, C)
    b2d = b.reshape(1, C).astype(jnp.float32)

    tm = _pick_tile(N, (512, 256, 128, 64, 32, 16, 8))
    tk = _pick_tile(K, (2048, 1024, 512, 256, 128))

    return pl.pallas_call(
        _base_kernel,
        out_shape=jax.ShapeDtypeStruct((N, C), jnp.float32),
        grid=(N // tm, K // tk),
        in_specs=[
            pl.BlockSpec((tm, tk), lambda i, k: (i, k)),
            pl.BlockSpec((tk, C), lambda i, k: (k, 0)),
            pl.BlockSpec((1, C), lambda i, k: (0, 0)),
        ],
        out_specs=pl.BlockSpec((tm, C), lambda i, k: (i, 0)),
        scratch_shapes=[pltpu.VMEM((tm, C), jnp.float32)],
        compiler_params=pltpu.CompilerParams(
            dimension_semantics=("parallel", "arbitrary"),
            vmem_limit_bytes=_vmem_limit_bytes(),
        ),
    )(x_flat, w_big, b2d)


# ----------------------------- embed_model kernel (fused + decomposed) -----------------------------
def _embed_kernel(a_ref, b_ref, wt_ref, brow_ref, o_ref):
    # a_ref   : (ta, C)     f32 rows of feats (probe + gallery, natural order), tiled over the grid
    # b_ref   : (Gp, C)     f32 zero-padded gallery features (resident across the grid)
    # wt_ref  : (2, C)      f32 bn_scale-folded classifier weight, class-major
    # brow_ref: (2, Gp)     f32 precomputed  sum_c B[j,c]^2 * w_eff[c,k] + const[k]   (hoisted)
    # o_ref   : (2, ta, Gp) f32 class-major pairwise scores
    ta = a_ref.shape[0]
    A = a_ref[...]
    B = b_ref[...]
    wt = wt_ref[...]
    brow = brow_ref[...]

    # a^2 term per class: (ta, 2).
    a_term = lax.dot_general(A * A, wt, (((1,), (1,)), ((), ())),
                             precision=lax.Precision.HIGHEST,
                             preferred_element_type=jnp.float32)

    # Single merged cross GEMM for both classes: [A*w0 ; A*w1] (2*ta, C) x B^T -> (2*ta, Gp).
    # f32 operands + HIGHEST precision: a^2 + b^2 - 2ab cancels on (near-)identical rows
    # (the gallery-gallery diagonal feeds a softmax + matrix inverse downstream), so the
    # cross term must not be a single-pass bf16 GEMM.
    lhs = jnp.concatenate([A * wt[0:1, :], A * wt[1:2, :]], axis=0)
    cross = lax.dot_general(lhs, B, (((1,), (1,)), ((), ())),
                            precision=lax.Precision.HIGHEST,
                            preferred_element_type=jnp.float32)

    for k in range(2):  # static unroll over the two classifier classes
        o_ref[k, :, :] = (a_term[:, k:k + 1] + brow[k:k + 1, :]
                          - 2.0 * cross[k * ta:(k + 1) * ta, :])


def embed_pair_scores(a_feat, b_feat, bn_scale, bn_shift, w_cls, b_cls):
    """Class-major pairwise scores (2, rows_A, G): every row of a_feat vs every row of b_feat."""
    rows, C = a_feat.shape
    G = b_feat.shape[0]

    # Fold eval-mode BN + classifier into w_eff / const once, in the wrapper.
    w_eff_t = (bn_scale[None, :] * w_cls.T).astype(jnp.float32)             # (2, C)
    const = (bn_shift @ w_cls + b_cls).astype(jnp.float32)                  # (2,)

    # Pad gallery rows to a lane-dense multiple of 128 (padded columns are sliced off below).
    Gp = _round_up(G, 128)
    b_pad = jnp.pad(b_feat.astype(jnp.float32), ((0, Gp - G), (0, 0)))

    # Gallery-side term hoisted out of the row grid (tiny (2, Gp) tensor, computed once).
    b_row = (jnp.einsum("kc,gc->kg", w_eff_t, b_pad * b_pad,
                        precision=lax.Precision.HIGHEST)
             + const[:, None])                                              # (2, Gp)

    ta = min(512, _round_up(rows, 8))
    rows_pad = _round_up(rows, ta)
    a_pad = a_feat.astype(jnp.float32)
    if rows_pad != rows:
        a_pad = jnp.pad(a_pad, ((0, rows_pad - rows), (0, 0)))

    out = pl.pallas_call(
        _embed_kernel,
        out_shape=jax.ShapeDtypeStruct((2, rows_pad, Gp), jnp.float32),
        grid=(rows_pad // ta,),
        in_specs=[
            pl.BlockSpec((ta, C), lambda i: (i, 0)),       # A rows, tiled over the grid
            pl.BlockSpec((Gp, C), lambda i: (0, 0)),       # gallery resident
            pl.BlockSpec((2, C), lambda i: (0, 0)),
            pl.BlockSpec((2, Gp), lambda i: (0, 0)),
        ],
        out_specs=pl.BlockSpec((2, ta, Gp), lambda i: (0, i, 0)),
        compiler_params=pltpu.CompilerParams(
            dimension_semantics=("parallel",),
            vmem_limit_bytes=_vmem_limit_bytes(),
        ),
    )(a_pad, b_pad, w_eff_t, b_row)
    return out[:, :rows, :G]                               # stays class-major; no full transpose


# ----------------------------- random_walk_compute -----------------------------
def random_walk_compute(scores_cm, num_ids, instances_num, alpha):
    # scores_cm: (2, N, G) class-major scores of every feats row vs every gallery row,
    #            rows in natural feats order (id-major, instance-minor).
    # TODO(synk): softmax + matrix inverse of the tiny (G, G) affinity have no Pallas primitive;
    #             computed with XLA (jax.nn.softmax / jnp.linalg.inv) exactly as in the spec.
    _, N, G = scores_cm.shape
    s = scores_cm.reshape(2, num_ids, instances_num, G)
    gg1 = s[1, :, 1:, :].reshape(G, G)                         # gallery-vs-gallery, class 1
    A = jax.nn.softmax(gg1, axis=1)                            # F.softmax dim=1 on the 2-D matrix
    W = (1.0 - alpha) * jnp.linalg.inv(jnp.eye(G, dtype=A.dtype) - alpha * A)
    W = W.T
    walked = jnp.einsum("kng,gh->knh", scores_cm, W,
                        precision=lax.Precision.HIGHEST)       # lane-dense (2, N, G) matmuls
    w = walked.reshape(2, num_ids, instances_num, G)
    # Re-emit the reference (-1, 2) layout only at the very end (tiny tensors).
    p_g = jnp.transpose(w[:, :, 0, :], (1, 2, 0)).reshape(-1, 2)                   # (P*G, 2)
    g_g = jnp.transpose(w[:, :, 1:, :].reshape(2, G, G), (1, 2, 0)).reshape(-1, 2)  # (G*G, 2)
    return jnp.concatenate([p_g, g_g], axis=0)


# ----------------------------- RandomWalkNetGrp.forward -----------------------------
def random_walk_net_grp_forward(x, params, instances_num=4, alpha=0.1):
    feats = base_model(x, params["w_base"], params["b_base"])               # (N, C) f32
    N, C = feats.shape
    num_ids = N // instances_num
    G = num_ids * (instances_num - 1)

    # Gallery rows (small (G, C) slice).  The probe/gallery split of the A side is NOT
    # materialized: scoring ALL feats rows against the gallery is exactly the union of the
    # reference's probe-vs-gallery and gallery-vs-gallery scores, so the previous version's
    # HBM concat/shuffle of feats is gone; rows are re-labelled by cheap reshapes afterwards.
    gallery = feats.reshape(num_ids, instances_num, C)[:, 1:, :].reshape(G, C)

    scores = embed_pair_scores(feats, gallery, params["bn_scale"], params["bn_shift"],
                               params["w_cls"], params["b_cls"])            # (2, N, G)

    # TODO(synk): single embed branch only (len(embed_model)==1); the 2048/len(embed)
    #             feature-chunk grouping of RandomWalkNetGrp is a no-op for one branch.
    #             Eval-mode (folded) BatchNorm only; training-mode batch statistics not done.
    return random_walk_compute(scores, num_ids, instances_num, alpha)       # ((P*G + G*G), 2)


def make_params(key, cin, c_feat):
    k1, k2, k3, k4, k5, k6, k7, k8 = jax.random.split(key, 8)
    gamma = 1.0 + 0.1 * jax.random.normal(k3, (c_feat,), jnp.float32)
    beta = 0.1 * jax.random.normal(k4, (c_feat,), jnp.float32)
    running_mean = 0.1 * jax.random.normal(k5, (c_feat,), jnp.float32)
    running_var = jnp.abs(1.0 + 0.1 * jax.random.normal(k6, (c_feat,), jnp.float32))
    eps = 1e-5
    bn_scale = gamma / jnp.sqrt(running_var + eps)
    bn_shift = beta - running_mean * bn_scale
    return {
        "w_base": 0.1 * jax.random.normal(k1, (cin, c_feat), jnp.float32),
        "b_base": 0.1 * jax.random.normal(k2, (c_feat,), jnp.float32),
        "bn_scale": bn_scale,
        "bn_shift": bn_shift,
        "w_cls": 0.1 * jax.random.normal(k7, (c_feat, 2), jnp.float32),
        "b_cls": 0.1 * jax.random.normal(k8, (2,), jnp.float32),
    }


if __name__ == "__main__":
    instances_num = 4
    num_ids = 2
    N, Cin, H, W = num_ids * instances_num, 4, 16, 16
    C = 128

    key = jax.random.PRNGKey(0)
    kx, kp = jax.random.split(key)
    x = jax.random.normal(kx, (N, Cin, H, W), jnp.float32)
    params = make_params(kp, Cin, C)

    fwd = jax.jit(functools.partial(random_walk_net_grp_forward,
                                    instances_num=instances_num, alpha=0.1))
    out = jax.block_until_ready(fwd(x, params))

    P = num_ids
    G = num_ids * (instances_num - 1)
    assert out.shape == (P * G + G * G, 2), out.shape
    assert bool(jnp.all(jnp.isfinite(out)))
    print("KERNEL_OK")
</pallas_src>

<mosaic_0001>
module attributes {stable_mosaic.version = 11 : i64} {
  func.func @_base_kernel(%arg0: i32, %arg1: i32, %arg2: memref<8x1024xf32, #tpu.memory_space<vmem>>, %arg3: memref<1024x128xbf16, #tpu.memory_space<vmem>>, %arg4: memref<1x128xf32, #tpu.memory_space<vmem>>, %arg5: memref<8x128xf32, #tpu.memory_space<vmem>>, %arg6: memref<8x128xf32, #tpu.memory_space<vmem>>) attributes {dimension_semantics = [#tpu.dimension_semantics<parallel>, #tpu.dimension_semantics<arbitrary>], iteration_bounds = array<i64: 1, 1>, scalar_prefetch = 0 : i64, scratch_operands = 1 : i64, tpu.core_type = #tpu.core_type<tc>, window_params = [{transform_indices = @transform_0, window_bounds = array<i64: 8, 1024>}, {transform_indices = @transform_1, window_bounds = array<i64: 1024, 128>}, {pipeline_mode = #tpu.pipeline_mode<synchronous>, transform_indices = @transform_2, window_bounds = array<i64: 1, 128>}, {transform_indices = @transform_3, window_bounds = array<i64: 8, 128>}]} {
    %c0_i32 = arith.constant 0 : i32
    %0 = arith.cmpi eq, %arg1, %c0_i32 : i32
    %1 = arith.extui %0 : i1 to i32
    %c0_i32_0 = arith.constant 0 : i32
    %2 = arith.cmpi ne, %1, %c0_i32_0 : i32
    scf.if %2 {
      %cst_10 = arith.constant 0.000000e+00 : f32
      %13 = vector.broadcast %cst_10 : f32 to vector<8x128xf32>
      %c0_11 = arith.constant 0 : index
      %c0_12 = arith.constant 0 : index
      %14 = vector.load %arg6[%c0_11, %c0_12] : memref<8x128xf32, #tpu.memory_space<vmem>>, vector<8x128xf32>
      tpu.vector_store %arg6[%c0_11, %c0_12], %13 {strides = array<i32>} : memref<8x128xf32, #tpu.memory_space<vmem>>, vector<8x128xf32>,
    } else {
    }
    %c0 = arith.constant 0 : index
    %c0_1 = arith.constant 0 : index
    %3 = vector.load %arg6[%c0, %c0_1] : memref<8x128xf32, #tpu.memory_space<vmem>>, vector<8x128xf32>
    %c0_2 = arith.constant 0 : index
    %c0_3 = arith.constant 0 : index
    %4 = vector.load %arg2[%c0_2, %c0_3] : memref<8x1024xf32, #tpu.memory_space<vmem>>, vector<8x1024xf32>
    %5 = arith.truncf %4 : vector<8x1024xf32> to vector<8x1024xbf16>
    %c0_4 = arith.constant 0 : index
    %c0_5 = arith.constant 0 : index
    %6 = vector.load %arg3[%c0_4, %c0_5] : memref<1024x128xbf16, #tpu.memory_space<vmem>>, vector<1024x128xbf16>
    %cst = arith.constant dense<0.000000e+00> : vector<8x128xf32>
    %7 = tpu.matmul %5, %6, %cst {dimension_numbers = #tpu.dot_dimension_numbers<[1], [0], [0], [1], [0, 0, 1, 1], [], []>} : vector<8x1024xbf16>, vector<1024x128xbf16>, vector<8x128xf32> -> vector<8x128xf32>
    %8 = arith.addf %3, %7 : vector<8x128xf32>
    %c0_6 = arith.constant 0 : index
    %c0_7 = arith.constant 0 : index
    %9 = vector.load %arg6[%c0_6, %c0_7] : memref<8x128xf32, #tpu.memory_space<vmem>>, vector<8x128xf32>
    tpu.vector_store %arg6[%c0_6, %c0_7], %8 {strides = array<i32>} : memref<8x128xf32, #tpu.memory_space<vmem>>, vector<8x128xf32>,
    %c0_i32_8 = arith.constant 0 : i32
    %10 = arith.cmpi eq, %arg1, %c0_i32_8 : i32
    %11 = arith.extui %10 : i1 to i32
    %c0_i32_9 = arith.constant 0 : i32
    %12 = arith.cmpi ne, %11, %c0_i32_9 : i32
    scf.if %12 {
      %c0_10 = arith.constant 0 : index
      %c0_11 = arith.constant 0 : index
      %13 = vector.load %arg6[%c0_10, %c0_11] : memref<8x128xf32, #tpu.memory_space<vmem>>, vector<8x128xf32>
      %c0_12 = arith.constant 0 : index
      %c0_13 = arith.constant 0 : index
      %14 = vector.load %arg4[%c0_12, %c0_13] : memref<1x128xf32, #tpu.memory_space<vmem>>, vector<1x128xf32>
      %15 = vector.broadcast %14 : vector<1x128xf32> to vector<8x128xf32>
      %16 = arith.addf %13, %15 : vector<8x128xf32>
      %c0_14 = arith.constant 0 : index
      %c0_15 = arith.constant 0 : index
      %17 = vector.load %arg5[%c0_14, %c0_15] : memref<8x128xf32, #tpu.memory_space<vmem>>, vector<8x128xf32>
      tpu.vector_store %arg5[%c0_14, %c0_15], %16 {strides = array<i32>} : memref<8x128xf32, #tpu.memory_space<vmem>>, vector<8x128xf32>,
    } else {
    }
    return
  }
  func.func @transform_0(%arg0: i32, %arg1: i32) -> (i32, i32) {
    %c0_i32 = arith.constant 0 : i32
    return %arg0, %arg1 : i32, i32
  }
  func.func @transform_1(%arg0: i32, %arg1: i32) -> (i32, i32) {
    %c0_i32 = arith.constant 0 : i32
    %c0_i32_0 = arith.constant 0 : i32
    return %arg1, %c0_i32 : i32, i32
  }
  func.func @transform_2(%arg0: i32, %arg1: i32) -> (i32, i32) {
    %c0_i32 = arith.constant 0 : i32
    %c0_i32_0 = arith.constant 0 : i32
    %c0_i32_1 = arith.constant 0 : i32
    return %c0_i32, %c0_i32_0 : i32, i32
  }
  func.func @transform_3(%arg0: i32, %arg1: i32) -> (i32, i32) {
    %c0_i32 = arith.constant 0 : i32
    %c0_i32_0 = arith.constant 0 : i32
    return %arg0, %c0_i32 : i32, i32
  }
}

module attributes {stable_mosaic.version = 11 : i64} {
  func.func @_embed_kernel(%arg0: i32, %arg1: memref<8x128xf32, #tpu.memory_space<vmem>>, %arg2: memref<128x128xf32, #tpu.memory_space<vmem>>, %arg3: memref<2x128xf32, #tpu.memory_space<vmem>>, %arg4: memref<2x128xf32, #tpu.memory_space<vmem>>, %arg5: memref<2x8x128xf32, #tpu.memory_space<vmem>>) attributes {dimension_semantics = [#tpu.dimension_semantics<parallel>], iteration_bounds = array<i64: 1>, scalar_prefetch = 0 : i64, scratch_operands = 0 : i64, tpu.core_type = #tpu.core_type<tc>, window_params = [{transform_indices = @transform_0, window_bounds = array<i64: 8, 128>}, {pipeline_mode = #tpu.pipeline_mode<synchronous>, transform_indices = @transform_1, window_bounds = array<i64: 128, 128>}, {pipeline_mode = #tpu.pipeline_mode<synchronous>, transform_indices = @transform_2, window_bounds = array<i64: 2, 128>}, {pipeline_mode = #tpu.pipeline_mode<synchronous>, transform_indices = @transform_3, window_bounds = array<i64: 2, 128>}, {transform_indices = @transform_4, window_bounds = array<i64: 2, 8, 128>}]} {
    %c0 = arith.constant 0 : index
    %c0_0 = arith.constant 0 : index
    %0 = vector.load %arg1[%c0, %c0_0] : memref<8x128xf32, #tpu.memory_space<vmem>>, vector<8x128xf32>
    %c0_1 = arith.constant 0 : index
    %c0_2 = arith.constant 0 : index
    %1 = vector.load %arg2[%c0_1, %c0_2] : memref<128x128xf32, #tpu.memory_space<vmem>>, vector<128x128xf32>
    %c0_3 = arith.constant 0 : index
    %c0_4 = arith.constant 0 : index
    %2 = vector.load %arg3[%c0_3, %c0_4] : memref<2x128xf32, #tpu.memory_space<vmem>>, vector<2x128xf32>
    %c0_5 = arith.constant 0 : index
    %c0_6 = arith.constant 0 : index
    %3 = vector.load %arg4[%c0_5, %c0_6] : memref<2x128xf32, #tpu.memory_space<vmem>>, vector<2x128xf32>
    %4 = arith.mulf %0, %0 : vector<8x128xf32>
    %cst = arith.constant dense<0.000000e+00> : vector<8x2xf32>
    %5 = tpu.matmul %4, %2, %cst {dimension_numbers = #tpu.dot_dimension_numbers<[1], [1], [0], [0], [0, 0, 1, 0], [], []>, precision = #tpu.contract_precision<fp32>} : vector<8x128xf32>, vector<2x128xf32>, vector<8x2xf32> -> vector<8x2xf32>
    %6 = vector.extract_strided_slice %2 {offsets = [0, 0], sizes = [1, 128], strides = [1, 1]} : vector<2x128xf32> to vector<1x128xf32>
    %7 = vector.broadcast %6 : vector<1x128xf32> to vector<8x128xf32>
    %8 = arith.mulf %0, %7 : vector<8x128xf32>
    %9 = vector.extract_strided_slice %2 {offsets = [1, 0], sizes = [1, 128], strides = [1, 1]} : vector<2x128xf32> to vector<1x128xf32>
    %10 = vector.broadcast %9 : vector<1x128xf32> to vector<8x128xf32>
    %11 = arith.mulf %0, %10 : vector<8x128xf32>
    %12 = tpu.concatenate %8, %11 in 0 : vector<8x128xf32>, vector<8x128xf32> -> vector<16x128xf32>
    %cst_7 = arith.constant dense<0.000000e+00> : vector<16x128xf32>
    %13 = tpu.matmul %12, %1, %cst_7 {dimension_numbers = #tpu.dot_dimension_numbers<[1], [1], [0], [0], [0, 0, 1, 0], [], []>, precision = #tpu.contract_precision<fp32>} : vector<16x128xf32>, vector<128x128xf32>, vector<16x128xf32> -> vector<16x128xf32>
    %14 = vector.extract_strided_slice %5 {offsets = [0, 0], sizes = [8, 1], strides = [1, 1]} : vector<8x2xf32> to vector<8x1xf32>
    %15 = vector.extract_strided_slice %3 {offsets = [0, 0], sizes = [1, 128], strides = [1, 1]} : vector<2x128xf32> to vector<1x128xf32>
    %16 = vector.broadcast %14 : vector<8x1xf32> to vector<8x128xf32>
    %17 = vector.broadcast %15 : vector<1x128xf32> to vector<8x128xf32>
    %18 = arith.addf %16, %17 : vector<8x128xf32>
    %19 = vector.extract_strided_slice %13 {offsets = [0, 0], sizes = [8, 128], strides = [1, 1]} : vector<16x128xf32> to vector<8x128xf32>
    %cst_8 = arith.constant 2.000000e+00 : f32
    %20 = vector.broadcast %cst_8 : f32 to vector<8x128xf32>
    %21 = arith.mulf %20, %19 : vector<8x128xf32>
    %22 = arith.subf %18, %21 : vector<8x128xf32>
    %c0_9 = arith.constant 0 : index
    %c0_10 = arith.constant 0 : index
    %c0_11 = arith.constant 0 : index
    %23 = vector.load %arg5[%c0_9, %c0_10, %c0_11] : memref<2x8x128xf32, #tpu.memory_space<vmem>>, vector<1x8x128xf32>
    %24 = vector.shape_cast %23 : vector<1x8x128xf32> to vector<8x128xf32>
    %25 = vector.shape_cast %22 : vector<8x128xf32> to vector<1x8x128xf32>
    tpu.vector_store %arg5[%c0_9, %c0_10, %c0_11], %25 {strides = array<i32>} : memref<2x8x128xf32, #tpu.memory_space<vmem>>, vector<1x8x128xf32>,
    %26 = vector.extract_strided_slice %5 {offsets = [0, 1], sizes = [8, 1], strides = [1, 1]} : vector<8x2xf32> to vector<8x1xf32>
    %27 = vector.extract_strided_slice %3 {offsets = [1, 0], sizes = [1, 128], strides = [1, 1]} : vector<2x128xf32> to vector<1x128xf32>
    %28 = vector.broadcast %26 : vector<8x1xf32> to vector<8x128xf32>
    %29 = vector.broadcast %27 : vector<1x128xf32> to vector<8x128xf32>
    %30 = arith.addf %28, %29 : vector<8x128xf32>
    %31 = vector.extract_strided_slice %13 {offsets = [8, 0], sizes = [8, 128], strides = [1, 1]} : vector<16x128xf32> to vector<8x128xf32>
    %cst_12 = arith.constant 2.000000e+00 : f32
    %32 = vector.broadcast %cst_12 : f32 to vector<8x128xf32>
    %33 = arith.mulf %32, %31 : vector<8x128xf32>
    %34 = arith.subf %30, %33 : vector<8x128xf32>
    %c1 = arith.constant 1 : index
    %c0_13 = arith.constant 0 : index
    %c0_14 = arith.constant 0 : index
    %35 = vector.load %arg5[%c1, %c0_13, %c0_14] : memref<2x8x128xf32, #tpu.memory_space<vmem>>, vector<1x8x128xf32>
    %36 = vector.shape_cast %35 : vector<1x8x128xf32> to vector<8x128xf32>
    %37 = vector.shape_cast %34 : vector<8x128xf32> to vector<1x8x128xf32>
    tpu.vector_store %arg5[%c1, %c0_13, %c0_14], %37 {strides = array<i32>} : memref<2x8x128xf32, #tpu.memory_space<vmem>>, vector<1x8x128xf32>,
    return
  }
  func.func @transform_0(%arg0: i32) -> (i32, i32) {
    %c0_i32 = arith.constant 0 : i32
    %c0_i32_0 = arith.constant 0 : i32
    return %arg0, %c0_i32 : i32, i32
  }
  func.func @transform_1(%arg0: i32) -> (i32, i32) {
    %c0_i32 = arith.constant 0 : i32
    %c0_i32_0 = arith.constant 0 : i32
    %c0_i32_1 = arith.constant 0 : i32
    return %c0_i32, %c0_i32_0 : i32, i32
  }
  func.func @transform_2(%arg0: i32) -> (i32, i32) {
    %c0_i32 = arith.constant 0 : i32
    %c0_i32_0 = arith.constant 0 : i32
    %c0_i32_1 = arith.constant 0 : i32
    return %c0_i32, %c0_i32_0 : i32, i32
  }
  func.func @transform_3(%arg0: i32) -> (i32, i32) {
    %c0_i32 = arith.constant 0 : i32
    %c0_i32_0 = arith.constant 0 : i32
    %c0_i32_1 = arith.constant 0 : i32
    return %c0_i32, %c0_i32_0 : i32, i32
  }
  func.func @transform_4(%arg0: i32) -> (i32, i32, i32) {
    %c0_i32 = arith.constant 0 : i32
    %c0_i32_0 = arith.constant 0 : i32
    %c0_i32_1 = arith.constant 0 : i32
    return %c0_i32, %arg0, %c0_i32_0 : i32, i32, i32
  }
}

</mosaic_0001>

<bundles_post_ra>
// kernel: squeeze.4
= control target key start
LH: loop header
LB: loop body
LE: loop exit
PB: predicated region body
PF: predicated region fallthrough
CT: control target
= control target key end

     0   :  { %vm11_vm0 = vcmask 48128   ;;  %s42_s0 = inlined_call_operand.vmem [shape: f32[1,2,3,6], index: 0, kind: input, shape index: {}]   ;;  %s43_s1 = inlined_call_operand.vmem [shape: f32[6,6], index: 1, kind: output, shape index: {}]  }
   0x1   :  { %v18_v0 = vld [vmem:[%s42_s0 + $0x4] sm:$0xf]  ;;  %v8_v1 = vld [vmem:[%s42_s0] sm:$0xf] }
   0x2   :  { %7 = vst [vmem:[#allocation0 + $0x8] sm:$0xf] %v18_v0 }
   0x3   :  { %9 = vst [vmem:[#allocation0] sm:$0xf] %v8_v1 }
   0x9   :  { %v14_v2 = vld [vmem:[#allocation0 + $0x8] sm:$0x7]  }
   0xa   :  { %v10_v3 = vld [vmem:[#allocation0] sm:$0x7]   ;;  %19 = vst.msk [vmem:[%s43_s1 + $0x3] sm:$0x7] %vm11_vm0, %v14_v2  }
   0xb   :  { %12 = vst.msk [vmem:[%s43_s1] sm:$0x7] %vm11_vm0, %v10_v3  }

// kernel: div.9
= control target key start
LH: loop header
LB: loop body
LE: loop exit
PB: predicated region body
PF: predicated region fallthrough
CT: control target
= control target key end

     0   :  { %vm7_vm0 = vcmask 23552   ;;  %vm13_vm1 = vcmask 48152   ;;  %s39_s0 = inlined_call_operand.vmem [shape: f32[2,3], index: 0, kind: input, shape index: {}]   ;;  %s40_s1 = inlined_call_operand.vmem [shape: f32[6], index: 1, kind: output, shape index: {}]  }
   0x1   :  { %v4_v0 = vld [vmem:[%s39_s0] sm:$0x3]  ;;  %s22_s0 = smov 3  }
   0x2   :  { %5 = vst [vmem:[#allocation1] sm:$0x3] %v4_v0 }
   0x9   :  { %v10_v1 = vld [vmem:[#allocation1 + $0x1] sm:$0x1]   ;;  %v6_v2 = vld [vmem:[#allocation1] sm:$0x1]  }
   0xa   :  { %11 = vrot.lane.b32.xlu0 %v10_v1, %s22_s0  ;;  %8 = vst.msk [vmem:[#allocation0] sm:$0x1] %vm7_vm0, %v6_v2  }
  0x7c   :  { %v12_v3 = vpop.permute.xlu0 %11  }
  0x7d   :  { %14 = vst.msk [vmem:[#allocation0] sm:$0x1] %vm13_vm1, %v12_v3  }
  0x84   :  { %v17_v4 = vld [vmem:[#allocation0] sm:$0x1] }
  0x85   :  { %20 = vst [vmem:[%s40_s1] sm:$0x1] %v17_v4 }

// kernel: custom-call.11
= control target key start
LH: loop header
LB: loop body
LE: loop exit
PB: predicated region body
PF: predicated region fallthrough
CT: control target
= control target key end

     0   :  { %5 = vsyncpa [#allocation4], 0  ;;  %s683_s12 = smov [#allocation0]   ;;  %s780_s0 = inlined_call_operand.vmem [shape: f32[6,6], index: 0, kind: input, shape index: {}]   ;;  %s781_s1 = inlined_call_operand.vmem [shape: f32[6,6], index: 1, kind: output, shape index: {0}]   ;;  %s782_s2 = inlined_call_operand.hbm [shape: s32[6], index: 2, kind: output, shape index: {1}]   ;;  %s783_s3 = inlined_call_operand.vmem [shape: s32[6], index: 3, kind: output, shape index: {2}]  }
   0x1   :  { %s687_s15 = smov %s780_s0  }
   0x2 LB: > { %v49_v0 = vld [vmem:[%s689_s15] sm:$0xff]  ;;  %s51_s15 = scalar_lea.vmem %s689_s15, 8   ;;  %s689_s15 = sphi %s687_s15, %s51_s15   ;;  %s685_s12 = sphi %s683_s12, %s52_s12  }
   0x3   : > { %50 = vst [vmem:[%s685_s12] sm:$0xff] %v49_v0  ;;  %s52_s12 = scalar_lea.vmem %s685_s12, 8   ;;  %p46_p0 = scmp.gt.s32.totalorder %s51_s15, %s780_s0 }
   0x4   :  { %v65_v2 = vlaneseq (%p46_p0)  ;;  %v703_v3 = vmov (%p46_p0), 0   ;;  %s735_s18 = smov (%p46_p0), 0  }
   0x5   :  { %48 = sbr.rel (!%p46_p0) target bundleno = 2 (0x2), region = 152  ;;  %64 = vst [vmem:[#allocation2] sm:$0x1] (%p46_p0), %v703_v3 }
   0x6   :  { %v732_v4 = vshrl.u32 (%p46_p0), %v65_v2, 7 }
   0x8   :  { %69 = vst [vmem:[#allocation7] sm:$0xff] (%p46_p0), %v732_v4 }
   0xa   :  { %v62_v1 = vld [vmem:[#allocation0] sm:$0xff] }
   0xb   :  { %63 = vst [vmem:[#allocation1] sm:$0xff] %v62_v1 }
   0xc LB: > { %vm85_vm0 = vcmp.lt.s32.totalorder %v732_v4, 6  ;;  %v742_v7 = vstv %s693_s18  ;;  %s126_s0 = ssub.s32 128, %s693_s18  ;;  %v132_v38 = vand.u32 127, %v65_v2  ;;  %s138_s19 = scalar_lea.vmem [#allocation1], %s693_s18  ;;  %v135_v41 = vld [vmem:[#allocation2] ss:$0 sm:$0xff]  ;;  %s693_s18 = sphi %s735_s18, %s75_s18  }
   0xd   : > { %vm84_vm1 = vcmp.ge.s32.totalorder %v732_v4, %v742_v7  ;;  %s144_s22 = scalar_lea.vmem [#allocation7], %s693_s18  ;;  %vm164_vm14 = vcmp.gt.s32.totalorder %v732_v4, %v742_v7  ;;  %s75_s18 = sadd.s32 1, %s693_s18  }
   0xe   : > { %vm86_vm3 = vmand %vm84_vm1, %vm85_vm0  ;;  %vm133_vm12 = vcmp.eq.s32.totalorder %v132_v38, %v742_v7  ;;  %p72_p1 = scmp.ge.s32.totalorder %s75_s18, 6  }
   0xf   : > { %v146_v43 = vld [vmem:[%s144_s22] ss:$0 sm:$0xff]  ;;  %s695_s26 = smov (%p72_p1), %s781_s1   ;;  %s699_s27 = smov (%p72_p1), [#allocation1]  }
  0x12   : > { %v80_v5 = vld [vmem:[#allocation1] sm:$0xff]  ;;  %v140_v39 = vld [vmem:[%s138_s19] ss:$0 sm:$0xff] }
  0x13   : > { %v81_v6 = vand.u32 2147483647, %v80_v5 }
  0x15   : > { %vm462_vm2 = vcmp.gt.f32.partialorder %v81_v6, -inf }
  0x16   : > { %vm88_vm4 = vmand %vm86_vm3, %vm462_vm2 }
  0x17   : > { %v89_v8 = vsel %vm88_vm4, %v732_v4, %v742_v7  ;;  %v90_v9 = vsel %vm88_vm4, %v81_v6, -inf  ;;  %vm181_vm4 = vmand %vm164_vm14, %vm133_vm12 }
  0x18   : > { %v91_v10 = vrot.slane %v90_v9, 1  ;;  %v92_v11 = vrot.slane %v89_v8, 1 }
  0x1a   : > { %vm93_vm5 = vcmp.ge.f32.partialorder %v91_v10, %v90_v9  ;;  %v96_v12 = vrot.slane %v91_v10, 1  ;;  %v97_v13 = vrot.slane %v92_v11, 1 }
  0x1b   : > { %v94_v14 = vsel %vm93_vm5, %v91_v10, %v90_v9  ;;  %v95_v15 = vsel %vm93_vm5, %v92_v11, %v89_v8  ;;  %vm156_vm5 = vcmp.gt.s32.totalorder %v132_v38, %v742_v7 }
  0x1c   : > { %vm98_vm6 = vcmp.ge.f32.partialorder %v96_v12, %v94_v14  ;;  %v101_v16 = vrot.slane %v96_v12, 1  ;;  %v102_v17 = vrot.slane %v97_v13, 1 }
  0x1d   : > { %v99_v18 = vsel %vm98_vm6, %v96_v12, %v94_v14  ;;  %v100_v19 = vsel %vm98_vm6, %v97_v13, %v95_v15 }
  0x1e   : > { %vm103_vm7 = vcmp.ge.f32.partialorder %v101_v16, %v99_v18  ;;  %v106_v20 = vrot.slane %v101_v16, 1  ;;  %v107_v21 = vrot.slane %v102_v17, 1 }
  0x1f   : > { %v104_v22 = vsel %vm103_vm7, %v101_v16, %v99_v18  ;;  %v105_v23 = vsel %vm103_vm7, %v102_v17, %v100_v19 }
  0x20   : > { %vm108_vm8 = vcmp.ge.f32.partialorder %v106_v20, %v104_v22  ;;  %v111_v24 = vrot.slane %v106_v20, 1  ;;  %v112_v25 = vrot.slane %v107_v21, 1 }
  0x21   : > { %v109_v26 = vsel %vm108_vm8, %v106_v20, %v104_v22  ;;  %v110_v27 = vsel %vm108_vm8, %v107_v21, %v105_v23 }
  0x22   : > { %vm113_vm9 = vcmp.ge.f32.partialorder %v111_v24, %v109_v26  ;;  %v116_v28 = vrot.slane %v111_v24, 1  ;;  %v117_v29 = vrot.slane %v112_v25, 1 }
  0x23   : > { %v114_v30 = vsel %vm113_vm9, %v111_v24, %v109_v26  ;;  %v115_v31 = vsel %vm113_vm9, %v112_v25, %v110_v27 }
  0x24   : > { %vm118_vm10 = vcmp.ge.f32.partialorder %v116_v28, %v114_v30  ;;  %v121_v32 = vrot.slane %v116_v28, 1  ;;  %v122_v33 = vrot.slane %v117_v29, 1 }
  0x25   : > { %v119_v34 = vsel %vm118_vm10, %v116_v28, %v114_v30  ;;  %v120_v35 = vsel %vm118_vm10, %v117_v29, %v115_v31 }
  0x26   : > { %vm123_vm11 = vcmp.ge.f32.partialorder %v121_v32, %v119_v34 }
  0x27   : > { %v125_v36 = vsel %vm123_vm11, %v122_v33, %v120_v35 }
  0x28   : > { %127 = vrot.lane.b32.xlu0 %v125_v36, %s126_s0 }
  0x9a   : > { %v128_v37 = vpop.permute.xlu0 %127 }
  0x9b   : > { %470 = vpush %v128_v37 }
  0xcc   : > { %s471_s20 = spop %470 }
  0xcd   : > { %v134_v40 = vstv %s471_s20  ;;  %s139_s21 = scalar_lea.vmem [#allocation1], %s471_s20  ;;  %s145_s23 = scalar_lea.vmem [#allocation7], %s471_s20 }
  0xce   : > { %v141_v42 = vld [vmem:[%s139_s21] ss:$0 sm:$0xff]  ;;  %v136_v45 = vsel %vm133_vm12, %v134_v40, %v135_v41 }
  0xcf   : > { %v147_v44 = vld [vmem:[%s145_s23] ss:$0 sm:$0xff]  ;;  %142 = vst [vmem:[%s139_s21] sm:$0x1] %v140_v39  ;;  %vm150_vm13 = vcmp.ne.f32.partialorder %v141_v42, 0.0  ;;  %v157_v61 = vsel %vm156_vm5, %v141_v42, 0.0 }
  0xd0   : > { %143 = vst [vmem:[%s138_s19] sm:$0x1] %v141_v42  ;;  %vm151_vm15 = vmand %vm133_vm12, %vm150_vm13 }
  0xd1   : > { %148 = vst [vmem:[%s145_s23] sm:$0x1] %v146_v43  ;;  %v152_v46 = vsel %vm151_vm15, %v141_v42, 1.0 }
  0xd2   : > { %149 = vst [vmem:[%s144_s22] sm:$0x1] %v147_v44  ;;  %v165_v47 = vsel %vm164_vm14, %v152_v46, 1.0 }
  0xd3   : > { %595 = vrcp.f32 %v165_v47  ;;  %137 = vst [vmem:[#allocation2] sm:$0x1] %v136_v45  ;;  %v177_v51 = vand.u32 2147483648, %v165_v47  ;;  %v175_v53 = vand.u32 2147483647, %v165_v47  ;;  %vm171_vm1 = vweird.f32 %v165_v47 }
  0xd5   : > { %v178_v55 = vor.u32 1.1754944e-38, %v177_v51  ;;  %vm176_vm3 = vcmp.eq.f32.partialorder %v175_v53, 8.507059e+37 }
  0xd7   : > { %v161_v57 = vld [vmem:[#allocation1] sm:$0xff] }
  0xd9   : > { %v596_v48 = vpop.eup %595  ;;  %v188_v1 = vld [vmem:[#allocation7] sm:$0xff] (%p72_p1) }
  0xda   : > { %v167_v49 = vmul.f32 %v596_v48, %v165_v47  ;;  %vm172_vm0 = vweird.f32 %v596_v48  ;;  %v239_v3 = vld [vmem:[#allocation2] sm:$0x1] (%p72_p1) }
  0xdb   : > { %vm173_vm2 = vmor %vm171_vm1, %vm172_vm0  ;;  %242 = vst [vmem:[#allocation3] sm:$0x1] (%p72_p1), %v239_v3 }
  0xdc   : > { %v168_v50 = vsub.f32 1.0, %v167_v49 }
  0xde   : > { %v169_v52 = vmul.f32 %v596_v48, %v168_v50 }
  0xe0   : > { %v170_v54 = vadd.f32 %v596_v48, %v169_v52 }
  0xe2   : > { %v174_v56 = vsel %vm173_vm2, %v596_v48, %v170_v54 }
  0xe3   : > { %v179_v58 = vsel %vm176_vm3, %v178_v55, %v174_v56 }
  0xe4   : > { %v180_v59 = vmul.f32 %v179_v58, %v161_v57 }
  0xe6   : > { %v182_v60 = vsel %vm181_vm4, %v180_v59, 0.0 }
  0xe7   : > { %183 = vadd.xlane.f32.xlu0 %v182_v60 }
 0x110   :  { %204 = vxpose.xlu0.b32.start.end [1/1] (short) (narrow) (%p72_p1), %v188_v1, 8 }
 0x15a   : > { %v184_v62 = vpop.xlane.xlu0 %183 }
 0x15b   : > { %v185_v63 = vmul.f32 %v184_v62, %v157_v61  ;;  %74 = sbr.rel (!%p72_p1) target bundleno = 12 (0xc), region = 163 }
 0x15d   : > { %v186_v0 = vsub.f32 %v180_v59, %v185_v63 }
 0x15f   : > { %187 = vst [vmem:[#allocation1] sm:$0xff] %v186_v0 }
 0x1b4   :  { %v220_v5 = vpop.trf.xlu0 }
 0x1b5   :  { %236 = vst [vmem:[#allocation5] sm:$0x1] %v220_v5 }
 0x1bc   :  { %v245_v6 = vld [vmem:[#allocation5] sm:$0x1] }
 0x1bd   :  { %248 = vst [vmem:[#allocation6] sm:$0x1] %v245_v6 }
 0x1be LB: > { %v292_v7 = vld [vmem:[%s701_s27] sm:$0xff]  ;;  %s294_s27 = scalar_lea.vmem %s701_s27, 8   ;;  %s701_s27 = sphi %s699_s27, %s294_s27   ;;  %s697_s26 = sphi %s695_s26, %s295_s26  }
 0x1bf   : > { %293 = vst [vmem:[%s697_s26] sm:$0xff] %v292_v7  ;;  %s295_s26 = scalar_lea.vmem %s697_s26, 8   ;;  %p289_p2 = scmp.gt.s32.totalorder %s294_s27, [#allocation1] }
 0x1c0   :  { %s312_s30 = sshll.u32 (%p289_p2), %s782_s2, 4  ;;  %s704_s4 = smov (%p289_p2), [#allocation3]   ;;  %s313_s30 = int_to_ptr.hbm [resolvable:$true] %s312_s30 }
 0x1c1   :  { %291 = sbr.rel (!%p289_p2) target bundleno = 446 (0x1be), region = 185  ;;  %s310_s1 = sshll.u32 (%p289_p2), %s704_s4, 4  ;;  %s311_s1 = int_to_ptr.vmem [resolvable:$true] %s310_s1 }
 0x1c2   :  { %315 = dma.vmem_to_hbm [thread:$0]  (%p289_p2), %s311_s1, 16, %s313_s30, [#allocation4]  }
 0x1c4   :  { %v372_v2 = vld [vmem:[#allocation6] sm:$0x1] (%p289_p2) }
 0x1c5   :  { %373 = vst [vmem:[%s783_s3] sm:$0x1] (%p289_p2), %v372_v2 }
 0x1c6   :  { %681 = dma.done.wait [#allocation4], 16  }
 0x1c7   :  { %682 = vsyncadd [#allocation4], 4294967280 }
 0x1c8   :  { %380 = vsyncpa [#allocation4], 1 }

// kernel: custom-call.13
= control target key start
LH: loop header
LB: loop body
LE: loop exit
PB: predicated region body
PF: predicated region fallthrough
CT: control target
= control target key end

     0   :  { %v35_v0 = vlaneseq  ;;  %v188_v18 = vmov -1.0   ;;  %s228_s0 = inlined_call_operand.vmem [shape: f32[1,6,6], index: 0, kind: input, shape index: {}]   ;;  %s229_s1 = inlined_call_operand.vmem [shape: f32[1,6,6], index: 1, kind: output, shape index: {}]  }
   0x1   :  { %v30_v1 = vld [vmem:[%s228_s0] sm:$0xff] }
   0x2   :  { %v202_v2 = vand.u32 127, %v35_v0  ;;  %v39_v3 = vshrl.u32 %v35_v0, 7 }
   0x4   :  { %vm41_vm0 = vcmp.eq.s32.totalorder %v39_v3, %v202_v2  ;;  %vm37_vm1 = vcmp.lt.s32.totalorder %v202_v2, 6  ;;  %vm46_vm2 = vcmp.ge.s32.totalorder %v39_v3, %v202_v2  ;;  %vm73_vm8 = vcmp.eq.s32.totalorder %v202_v2, 0 }
   0x5   :  { %v43_v4 = vsel %vm41_vm0, %v30_v1, 0.0  ;;  %vm47_vm3 = vmand %vm46_vm2, %vm37_vm1  ;;  %vm70_vm9 = vcmp.eq.s32.totalorder %v202_v2, %v39_v3  ;;  %v74_v19 = vsel %vm73_vm8, 1.0, %v188_v18  ;;  %vm81_vm10 = vcmp.eq.s32.totalorder %v202_v2, 1 }
   0x6   :  { %44 = vadd.xlane.f32.xlu0 %v43_v4  ;;  %v48_v13 = vsel %vm47_vm3, %v30_v1, 0.0  ;;  %v75_v20 = vsel %vm70_vm9, %v74_v19, 0.0  ;;  %vm91_vm11 = vcmp.eq.s32.totalorder %v202_v2, 2  ;;  %vm101_vm12 = vcmp.eq.s32.totalorder %v202_v2, 3 }
   0x7   :  { %vm111_vm13 = vcmp.eq.s32.totalorder %v202_v2, 4  ;;  %vm121_vm14 = vcmp.eq.s32.totalorder %v202_v2, 5 }
  0x79   :  { %v205_v5 = vpop.xlane.xlu0 %44 }
  0x7a   :  { %186 = vrcp.f32 %v205_v5  ;;  %v60_v9 = vand.u32 2147483648, %v205_v5  ;;  %v58_v11 = vand.u32 2147483647, %v205_v5  ;;  %vm54_vm5 = vweird.f32 %v205_v5 }
  0x7c   :  { %v61_v14 = vor.u32 1.1754944e-38, %v60_v9  ;;  %vm59_vm7 = vcmp.eq.f32.partialorder %v58_v11, 8.507059e+37 }
  0x80   :  { %v187_v6 = vpop.eup %186 }
  0x81   :  { %v50_v7 = vmul.f32 %v187_v6, %v205_v5  ;;  %vm55_vm4 = vweird.f32 %v187_v6 }
  0x82   :  { %vm56_vm6 = vmor %vm54_vm5, %vm55_vm4 }
  0x83   :  { %v51_v8 = vsub.f32 1.0, %v50_v7 }
  0x85   :  { %v52_v10 = vmul.f32 %v187_v6, %v51_v8 }
  0x87   :  { %v53_v12 = vadd.f32 %v187_v6, %v52_v10 }
  0x89   :  { %v57_v15 = vsel %vm56_vm6, %v187_v6, %v53_v12 }
  0x8a   :  { %v62_v16 = vsel %vm59_vm7, %v61_v14, %v57_v15 }
  0x8b   :  { %v63_v17 = vmul.f32 %v62_v16, %v48_v13 }
  0x8d   :  { %64 = vst [vmem:[#allocation2] sm:$0xff] %v63_v17 }
  0x94   :  { %v77_v21 = vld [vmem:[#allocation2 + $0x1] ss:$0 sm:$0xff]  ;;  %v87_v24 = vld [vmem:[#allocation2 + $0x2] ss:$0 sm:$0xff]  ;;  %v97_v29 = vld [vmem:[#allocation2 + $0x3] ss:$0 sm:$0xff] }
  0x95   :  { %v78_v22 = vxor.u32 2147483648, %v77_v21  ;;  %v88_v26 = vxor.u32 2147483648, %v87_v24  ;;  %v98_v31 = vxor.u32 2147483648, %v97_v29  ;;  %v107_v34 = vld [vmem:[#allocation2 + $0x4] ss:$0 sm:$0xff] }
  0x96   :  { %v108_v36 = vxor.u32 2147483648, %v107_v34  ;;  %v117_v39 = vld [vmem:[#allocation2 + $0x5] ss:$0 sm:$0xff] }
  0x97   :  { %v82_v23 = vmul.f32 %v78_v22, %v75_v20  ;;  %v118_v41 = vxor.u32 2147483648, %v117_v39 }
  0x99   :  { %83 = vadd.xlane.f32.xlu0 %v82_v23 }
 0x10c   :  { %v84_v25 = vpop.xlane.xlu0 %83 }
 0x10d   :  { %v85_v27 = vsel %vm81_vm10, %v84_v25, %v75_v20 }
 0x10e   :  { %v92_v28 = vmul.f32 %v88_v26, %v85_v27 }
 0x110   :  { %93 = vadd.xlane.f32.xlu1 %v92_v28 }
 0x183   :  { %v94_v30 = vpop.xlane.xlu1 %93 }
 0x184   :  { %v95_v32 = vsel %vm91_vm11, %v94_v30, %v85_v27 }
 0x185   :  { %v102_v33 = vmul.f32 %v98_v31, %v95_v32 }
 0x187   :  { %103 = vadd.xlane.f32.xlu1 %v102_v33 }
 0x1fa   :  { %v104_v35 = vpop.xlane.xlu1 %103 }
 0x1fb   :  { %v105_v37 = vsel %vm101_vm12, %v104_v35, %v95_v32 }
 0x1fc   :  { %v112_v38 = vmul.f32 %v108_v36, %v105_v37 }
 0x1fe   :  { %113 = vadd.xlane.f32.xlu2 %v112_v38 }
 0x271   :  { %v114_v40 = vpop.xlane.xlu2 %113 }
 0x272   :  { %v115_v42 = vsel %vm111_vm13, %v114_v40, %v105_v37 }
 0x273   :  { %v122_v43 = vmul.f32 %v118_v41, %v115_v42 }
 0x275   :  { %123 = vadd.xlane.f32.xlu2 %v122_v43 }
 0x2e8   :  { %v124_v44 = vpop.xlane.xlu2 %123 }
 0x2e9   :  { %v125_v45 = vsel %vm121_vm14, %v124_v44, %v115_v42 }
 0x2ea   :  { %v140_v46 = vmul.f32 %v125_v45, %v62_v16 }
 0x2ec   :  { %v142_v47 = vsel %vm54_vm5, %v125_v45, %v140_v46 }
 0x2ed   :  { %173 = vst [vmem:[%s229_s1] sm:$0xff] %v142_v47 }

// kernel: random_walk_net_grp_forward.3
= control target key start
LH: loop header
LB: loop body
LE: loop exit
PB: predicated region body
PF: predicated region fallthrough
CT: control target
= control target key end

     0   :  { %s936_s1 = inlined_call_operand.vmem [shape: f32[128,128], index: 1, kind: input, shape index: {}]   ;;  %s937_s2 = inlined_call_operand.vmem [shape: f32[2,128], index: 2, kind: input, shape index: {}]   ;;  %s938_s0 = inlined_call_operand.vmem [shape: f32[8,128], index: 0, kind: input, shape index: {}]   ;;  %s939_s3 = inlined_call_operand.vmem [shape: f32[2,128], index: 3, kind: input, shape index: {}]   ;;  %s940_s4 = inlined_call_operand.vmem [shape: f32[2,8,128], index: 4, kind: output, shape index: {}]  }
   0x1   :  { %v33_v0 = vld [vmem:[%s936_s1 + $0x78] sm:$0xff]  ;;  %v32_v1 = vld [vmem:[%s936_s1 + $0x70] sm:$0xff]  ;;  %v624_v2 = vld [vmem:[%s937_s2] sm:$0x3] }
   0x2   :  { %v626_v3 = vand.u32 4294901760, %v33_v0  ;;  %v628_v4 = vand.u32 4294901760, %v32_v1  ;;  %v52_v5 = vand.u32 4294901760, %v624_v2  ;;  %v634_v6 = vld [vmem:[%s938_s0] sm:$0xff]  ;;  %v31_v7 = vld [vmem:[%s936_s1 + $0x68] sm:$0xff]  ;;  %v29_v15 = vld [vmem:[%s936_s1 + $0x58] sm:$0xff] }
   0x3   :  { %v30_v8 = vld [vmem:[%s936_s1 + $0x60] sm:$0xff]  ;;  %v36_v9 = vmul.f32 %v634_v6, %v634_v6  ;;  %v644_v10 = vand.u32 4294901760, %v31_v7  ;;  %v667_v22 = vand.u32 4294901760, %v29_v15  ;;  %v28_v29 = vld [vmem:[%s936_s1 + $0x50] sm:$0xff]  ;;  %v27_v39 = vld [vmem:[%s936_s1 + $0x48] sm:$0xff] }
   0x4   :  { %v646_v11 = vand.u32 4294901760, %v30_v8  ;;  %188 = vmatpush.xpose.msra.mxu2 %v626_v3  ;;  %53 = vmatpush.xpose.msra.mxu0 %v52_v5  ;;  %v79_v12 = vsub.f32 %v624_v2, %v52_v5  ;;  %v651_v13 = vsub.f32 %v33_v0, %v626_v3  ;;  %v654_v14 = vsub.f32 %v32_v1, %v628_v4  ;;  %v26_v45 = vld [vmem:[%s936_s1 + $0x40] sm:$0xff]  ;;  %v25_v51 = vld [vmem:[%s936_s1 + $0x38] sm:$0xff]  ;;  %v24_v57 = vld [vmem:[%s936_s1 + $0x30] sm:$0xff] }
   0x5   :  { %v659_v16 = vand.u32 4294901760, %v36_v9  ;;  %v662_v17 = vsub.f32 %v31_v7, %v644_v10  ;;  %v684_v33 = vsub.f32 %v29_v15, %v667_v22  ;;  %v690_v37 = vand.u32 4294901760, %v28_v29  ;;  %v23_v63 = vld [vmem:[%s936_s1 + $0x28] sm:$0xff] }
   0x6   :  { %v80_v18 = vand.u32 4294901760, %v79_v12  ;;  %v238_v19 = vand.u32 4294901760, %v651_v13  ;;  %v244_v20 = vand.u32 4294901760, %v654_v14  ;;  %v670_v23 = vsub.f32 %v30_v8, %v646_v11 }
   0x7   :  { %v55_v21 = vsub.f32 %v36_v9, %v659_v16  ;;  %v250_v27 = vand.u32 4294901760, %v662_v17  ;;  %v262_v40 = vand.u32 4294901760, %v684_v33  ;;  %v701_v43 = vand.u32 4294901760, %v27_v39  ;;  %v22_v9 = vld [vmem:[%s936_s1 + $0x20] sm:$0xff] }
   0x8   :  { %106 = vmatpush.xpose.msrb.mxu0 %v79_v12  ;;  %190 = vmatpush.xpose.msra.mxu2 %v628_v4  ;;  %v81_v24 = vsub.f32 %v79_v12, %v80_v18  ;;  %v239_v25 = vsub.f32 %v651_v13, %v238_v19  ;;  %v245_v26 = vsub.f32 %v654_v14, %v244_v20  ;;  %v256_v36 = vand.u32 4294901760, %v670_v23 }
   0x9   :  { %v56_v28 = vand.u32 4294901760, %v55_v21  ;;  %v251_v35 = vsub.f32 %v662_v17, %v250_v27  ;;  %v704_v44 = vsub.f32 %v28_v29, %v690_v37  ;;  %v263_v46 = vsub.f32 %v684_v33, %v262_v40 }
   0xa   :  { %v82_v30 = vand.u32 4294901760, %v81_v24  ;;  %v240_v31 = vand.u32 4294901760, %v239_v25  ;;  %v246_v34 = vand.u32 4294901760, %v245_v26  ;;  %v257_v42 = vsub.f32 %v670_v23, %v256_v36  ;;  %v21_v24 = vld [vmem:[%s936_s1 + $0x18] sm:$0xff] }
   0xb   :  { %v57_v32 = vsub.f32 %v55_v21, %v56_v28  ;;  %v252_v41 = vand.u32 4294901760, %v251_v35  ;;  %v268_v48 = vand.u32 4294901760, %v704_v44  ;;  %v714_v49 = vand.u32 4294901760, %v26_v45 }
   0xc   :  { %83 = vmatpush.xpose.msra.mxu1 %v82_v30  ;;  %241 = vmatpush.xpose.msra.mxu3 %v240_v31  ;;  %v258_v47 = vand.u32 4294901760, %v257_v42  ;;  %v717_v50 = vsub.f32 %v27_v39, %v701_v43  ;;  %v264_v52 = vand.u32 4294901760, %v263_v46  ;;  %v727_v55 = vand.u32 4294901760, %v25_v51  ;;  %v20_v31 = vld [vmem:[%s936_s1 + $0x10] sm:$0xff] }
   0xd   :  { %v58_v38 = vand.u32 4294901760, %v57_v32  ;;  %192 = vmatpush.xpose.msra.mxu2 %v644_v10  ;;  %v269_v53 = vsub.f32 %v704_v44, %v268_v48  ;;  %v730_v56 = vsub.f32 %v26_v45, %v714_v49  ;;  %v738_v58 = vand.u32 4294901760, %v24_v57 }
   0xe   :  { %v274_v54 = vand.u32 4294901760, %v717_v50  ;;  %v745_v62 = vsub.f32 %v25_v51, %v727_v55  ;;  %v755_v0 = vand.u32 4294901760, %v23_v63  ;;  %v770_v12 = vand.u32 4294901760, %v22_v9 }
   0xf   :  { %59 = vmatmul.f32.vlgmr.msra.gmra.mxu0 %v58_v38  ;;  %85 = vmatmul.f32.vlgmr.msra.gmra.mxu1 %v659_v16  ;;  %v270_v59 = vand.u32 4294901760, %v269_v53  ;;  %v280_v61 = vand.u32 4294901760, %v730_v56  ;;  %v762_v8 = vsub.f32 %v24_v57, %v738_v58  ;;  %v792_v30 = vand.u32 4294901760, %v21_v24 }
  0x10   :  { %129 = vmatpush.xpose.msrb.mxu1 %v52_v5  ;;  %247 = vmatpush.xpose.msra.mxu3 %v246_v34  ;;  %v275_v60 = vsub.f32 %v717_v50, %v274_v54  ;;  %v286_v7 = vand.u32 4294901760, %v745_v62  ;;  %v786_v25 = vsub.f32 %v22_v9, %v770_v12  ;;  %v804_v38 = vand.u32 4294901760, %v20_v31 }
  0x11   :  { %155 = vmatpush.xpose.msra.mxu0 %v80_v18  ;;  %194 = vmatpush.xpose.msra.mxu2 %v646_v11  ;;  %v292_v18 = vand.u32 4294901760, %v762_v8  ;;  %v807_v39 = vsub.f32 %v21_v24, %v792_v30 }
  0x12   :  { %v276_v1 = vand.u32 4294901760, %v275_v60  ;;  %v304_v32 = vand.u32 4294901760, %v786_v25  ;;  %v822_v51 = vsub.f32 %v20_v31, %v804_v38 }
  0x13   :  { %v310_v46 = vand.u32 4294901760, %v807_v39 }
  0x14   :  { %177 = vmatpush.xpose.msra.mxu1 %v52_v5  ;;  %253 = vmatpush.xpose.msra.mxu3 %v252_v41  ;;  %v281_v5 = vsub.f32 %v730_v56, %v280_v61  ;;  %v19_v41 = vld [vmem:[%s936_s1 + $0x8] sm:$0xff]  ;;  %v305_v42 = vsub.f32 %v786_v25, %v304_v32 }
  0x15   :  { %196 = vmatpush.xpose.msra.mxu2 %v667_v22  ;;  %v311_v57 = vsub.f32 %v807_v39, %v310_v46 }
  0x16   :  { %v282_v15 = vand.u32 4294901760, %v281_v5  ;;  %v306_v53 = vand.u32 4294901760, %v305_v42 }
  0x17   :  { %109 = vmatmul.f32.vlgmr.msrb.gmra.mxu0 %v55_v21  ;;  %133 = vmatmul.f32.vlgmr.msrb.gmra.mxu1 %v56_v28  ;;  %v777_v21 = vsub.f32 %v23_v63, %v755_v0  ;;  %v293_v28 = vsub.f32 %v762_v8, %v292_v18 }
  0x18   :  { %259 = vmatpush.xpose.msra.mxu3 %v258_v47  ;;  %343 = vmatpush.xpose.msrb.mxu0 %v651_v13  ;;  %v819_v47 = vand.u32 4294901760, %v19_v41 }
  0x19   :  { %198 = vmatpush.xpose.msra.mxu2 %v690_v37  ;;  %401 = vmatpush.xpose.msrb.mxu1 %v626_v3  ;;  %v298_v29 = vand.u32 4294901760, %v777_v21  ;;  %v294_v34 = vand.u32 4294901760, %v293_v28 }
  0x1a   :  { %v837_v63 = vsub.f32 %v19_v41, %v819_v47 }
  0x1b   :  { %v299_v35 = vsub.f32 %v777_v21, %v298_v29 }
  0x1c   :  { %265 = vmatpush.xpose.msra.mxu3 %v264_v52  ;;  %346 = vmatpush.xpose.msrb.mxu0 %v654_v14  ;;  %v18_v52 = vld [vmem:[%s936_s1] sm:$0xff]  ;;  %v322_v9 = vand.u32 4294901760, %v837_v63 }
  0x1d   :  { %200 = vmatpush.xpose.msra.mxu2 %v701_v43  ;;  %403 = vmatpush.xpose.msrb.mxu1 %v628_v4  ;;  %v300_v45 = vand.u32 4294901760, %v299_v35  ;;  %v834_v60 = vand.u32 4294901760, %v18_v52  ;;  %v183_v35 = vperm.slane %v624_v2, 0 }
  0x1e   :  { %v323_v24 = vsub.f32 %v837_v63, %v322_v9 }
  0x1f   :  { %157 = vmatmul.f32.vlgmr.msra.gmra.mxu0 %v659_v16  ;;  %179 = vmatmul.f32.vlgmr.msra.gmra.mxu1 %v659_v16  ;;  %v287_v16 = vsub.f32 %v745_v62, %v286_v7  ;;  %v184_v41 = vmul.f32 %v183_v35, %v634_v6 }
  0x20   :  { %271 = vmatpush.xpose.msra.mxu3 %v270_v59  ;;  %349 = vmatpush.xpose.msrb.mxu0 %v662_v17  ;;  %v316_v59 = vand.u32 4294901760, %v822_v51  ;;  %v324_v28 = vand.u32 4294901760, %v323_v24 }
  0x21   :  { %202 = vmatpush.xpose.msra.mxu2 %v714_v49  ;;  %405 = vmatpush.xpose.msrb.mxu1 %v644_v10  ;;  %v288_v26 = vand.u32 4294901760, %v287_v16  ;;  %v219_v13 = vand.u32 4294901760, %v184_v41 }
  0x22   :  { %v317_v5 = vsub.f32 %v822_v51, %v316_v59 }
  0x24   :  { %277 = vmatpush.xpose.msra.mxu3 %v276_v1  ;;  %352 = vmatpush.xpose.msrb.mxu0 %v670_v23  ;;  %v312_v1 = vand.u32 4294901760, %v311_v57  ;;  %v318_v16 = vand.u32 4294901760, %v317_v5 }
  0x25   :  { %204 = vmatpush.xpose.msra.mxu2 %v727_v55  ;;  %407 = vmatpush.xpose.msrb.mxu1 %v646_v11 }
  0x28   :  { %283 = vmatpush.xpose.msra.mxu3 %v282_v15  ;;  %355 = vmatpush.xpose.msrb.mxu0 %v684_v33  ;;  %v847_v15 = vsub.f32 %v18_v52, %v834_v60 }
  0x29   :  { %206 = vmatpush.xpose.msra.mxu2 %v738_v58  ;;  %409 = vmatpush.xpose.msrb.mxu1 %v667_v22 }
  0x2c   :  { %289 = vmatpush.xpose.msra.mxu3 %v288_v26  ;;  %358 = vmatpush.xpose.msrb.mxu0 %v704_v44  ;;  %v328_v26 = vand.u32 4294901760, %v847_v15 }
  0x2d   :  { %208 = vmatpush.xpose.msra.mxu2 %v755_v0  ;;  %411 = vmatpush.xpose.msrb.mxu1 %v690_v37 }
  0x2e   :  { %v329_v31 = vsub.f32 %v847_v15, %v328_v26 }
  0x30   :  { %295 = vmatpush.xpose.msra.mxu3 %v294_v34  ;;  %361 = vmatpush.xpose.msrb.mxu0 %v717_v50  ;;  %v330_v34 = vand.u32 4294901760, %v329_v31 }
  0x31   :  { %210 = vmatpush.xpose.msra.mxu2 %v770_v12  ;;  %413 = vmatpush.xpose.msrb.mxu1 %v701_v43 }
  0x34   :  { %301 = vmatpush.xpose.msra.mxu3 %v300_v45  ;;  %364 = vmatpush.xpose.msrb.mxu0 %v730_v56 }
  0x35   :  { %212 = vmatpush.xpose.msra.mxu2 %v792_v30  ;;  %415 = vmatpush.xpose.msrb.mxu1 %v714_v49 }
  0x38   :  { %307 = vmatpush.xpose.msra.mxu3 %v306_v53  ;;  %367 = vmatpush.xpose.msrb.mxu0 %v745_v62 }
  0x39   :  { %214 = vmatpush.xpose.msra.mxu2 %v804_v38  ;;  %417 = vmatpush.xpose.msrb.mxu1 %v727_v55 }
  0x3c   :  { %313 = vmatpush.xpose.msra.mxu3 %v312_v1  ;;  %370 = vmatpush.xpose.msrb.mxu0 %v762_v8 }
  0x3d   :  { %216 = vmatpush.xpose.msra.mxu2 %v819_v47  ;;  %419 = vmatpush.xpose.msrb.mxu1 %v738_v58 }
  0x40   :  { %319 = vmatpush.xpose.msra.mxu3 %v318_v16  ;;  %373 = vmatpush.xpose.msrb.mxu0 %v777_v21 }
  0x41   :  { %218 = vmatpush.xpose.msra.mxu2 %v834_v60  ;;  %421 = vmatpush.xpose.msrb.mxu1 %v755_v0 }
  0x44   :  { %325 = vmatpush.xpose.msra.mxu3 %v324_v28  ;;  %376 = vmatpush.xpose.msrb.mxu0 %v786_v25 }
  0x45   :  { %448 = vmatpush.xpose.msrb.mxu2 %v238_v19  ;;  %423 = vmatpush.xpose.msrb.mxu1 %v770_v12  ;;  %v220_v19 = vsub.f32 %v184_v41, %v219_v13 }
  0x47   :  { %v221_v14 = vand.u32 4294901760, %v220_v19 }
  0x48   :  { %331 = vmatpush.xpose.msra.mxu3 %v330_v34  ;;  %379 = vmatpush.xpose.msrb.mxu0 %v807_v39 }
  0x49   :  { %452 = vmatpush.xpose.msrb.mxu2 %v244_v20  ;;  %425 = vmatpush.xpose.msrb.mxu1 %v792_v30  ;;  %v185_v20 = vperm.slane %v624_v2, 1 }
  0x4b   :  { %333 = vmatmul.f32.vlgmr.msra.gmra.mxu3 %v219_v13  ;;  %v186_v42 = vmul.f32 %v185_v20, %v634_v6 }
  0x4c   :  { %519 = vmatpush.xpose.msrb.mxu3 %v626_v3  ;;  %382 = vmatpush.xpose.msrb.mxu0 %v822_v51  ;;  %v222_v3 = vsub.f32 %v220_v19, %v221_v14 }
  0x4d   :  { %456 = vmatpush.xpose.msrb.mxu2 %v250_v27  ;;  %427 = vmatpush.xpose.msrb.mxu1 %v804_v38  ;;  %v227_v27 = vand.u32 4294901760, %v186_v42 }
  0x4e   :  { %v223_v17 = vand.u32 4294901760, %v222_v3 }
  0x4f   :  { %v228_v2 = vsub.f32 %v186_v42, %v227_v27 }
  0x50   :  { %521 = vmatpush.xpose.msrb.mxu3 %v628_v4  ;;  %385 = vmatpush.xpose.msrb.mxu0 %v837_v63 }
  0x51   :  { %460 = vmatpush.xpose.msrb.mxu2 %v256_v36  ;;  %429 = vmatpush.xpose.msrb.mxu1 %v819_v47  ;;  %v229_v4 = vand.u32 4294901760, %v228_v2 }
  0x52   :  { %224 = vmatmul.f32.vlgmr.msra.gmra.mxu2 %v223_v17 }
  0x53   :  { %337 = vmatmul.f32.gmra.mxu3 %v227_v27  ;;  %v230_v6 = vsub.f32 %v228_v2, %v229_v4 }
  0x54   :  { %523 = vmatpush.xpose.msrb.mxu3 %v644_v10  ;;  %388 = vmatpush.xpose.msrb.mxu0 %v847_v15 }
  0x55   :  { %464 = vmatpush.xpose.msrb.mxu2 %v262_v40  ;;  %431 = vmatpush.xpose.msrb.mxu1 %v834_v60  ;;  %v231_v10 = vand.u32 4294901760, %v230_v6 }
  0x57   :  { %391 = vmatmul.f32.vlgmr.msrb.gmra.mxu0 %v220_v19 }
  0x58   :  { %525 = vmatpush.xpose.msrb.mxu3 %v646_v11  ;;  %435 = vmatmul.f32.vlgmr.msrb.gmra.mxu1 %v221_v14  ;;  %v588_v11 = vmov 0  }
  0x59   :  { %468 = vmatpush.xpose.msrb.mxu2 %v268_v48  ;;  %586 = vset.pattern.permute.xlu0 %v588_v11 }
  0x5a   :  { %232 = vmatmul.f32.gmra.mxu2 %v231_v10 }
  0x5c   :  { %527 = vmatpush.xpose.msrb.mxu3 %v667_v22 }
  0x5d   :  { %472 = vmatpush.xpose.msrb.mxu2 %v274_v54  ;;  %v589_v54 = vmov 1  }
  0x5f   :  { %396 = vmatmul.f32.gmra.mxu0 %v228_v2 }
  0x60   :  { %529 = vmatpush.xpose.msrb.mxu3 %v690_v37  ;;  %441 = vmatmul.f32.gmra.mxu1 %v229_v4 }
  0x61   :  { %476 = vmatpush.xpose.msrb.mxu2 %v280_v61 }
  0x64   :  { %531 = vmatpush.xpose.msrb.mxu3 %v701_v43 }
  0x65   :  { %480 = vmatpush.xpose.msrb.mxu2 %v286_v7 }
  0x68   :  { %533 = vmatpush.xpose.msrb.mxu3 %v714_v49 }
  0x69   :  { %484 = vmatpush.xpose.msrb.mxu2 %v292_v18 }
  0x6c   :  { %535 = vmatpush.xpose.msrb.mxu3 %v727_v55 }
  0x6d   :  { %488 = vmatpush.xpose.msrb.mxu2 %v298_v29 }
  0x70   :  { %537 = vmatpush.xpose.msrb.mxu3 %v738_v58 }
  0x71   :  { %492 = vmatpush.xpose.msrb.mxu2 %v304_v32 }
  0x74   :  { %539 = vmatpush.xpose.msrb.mxu3 %v755_v0 }
  0x75   :  { %496 = vmatpush.xpose.msrb.mxu2 %v310_v46 }
  0x78   :  { %541 = vmatpush.xpose.msrb.mxu3 %v770_v12 }
  0x79   :  { %500 = vmatpush.xpose.msrb.mxu2 %v316_v59 }
  0x7c   :  { %543 = vmatpush.xpose.msrb.mxu3 %v792_v30  ;;  %v35_v30 = vld [vmem:[%s939_s3] sm:$0x3] }
  0x7d   :  { %504 = vmatpush.xpose.msrb.mxu2 %v322_v9  ;;  %v564_v46 = vperm.slane %v35_v30, 0  ;;  %v573_v5 = vperm.slane %v35_v30, 1 }
  0x80   :  { %545 = vmatpush.xpose.msrb.mxu3 %v804_v38 }
  0x81   :  { %508 = vmatpush.xpose.msrb.mxu2 %v328_v26 }
  0x84   :  { %547 = vmatpush.xpose.msrb.mxu3 %v819_v47  ;;  %510 = vmatmul.f32.vlgmr.msrb.gmra.mxu2 %v219_v13 }
  0x88   :  { %549 = vmatpush.xpose.msrb.mxu3 %v834_v60 }
  0x8b   :  { %551 = vmatmul.f32.vlgmr.msrb.gmra.mxu3 %v219_v13 }
  0x8c   :  { %514 = vmatmul.f32.gmra.mxu2 %v227_v27  ;;  %v60_v22 = vpop.f32.mrf.mxu0  ;;  %v86_v23 = vpop.f32.mrf.mxu1 }
  0x8d   :  { %v87_v37 = vadd.f32 %v86_v23, %v60_v22 }
  0x93   :  { %555 = vmatmul.f32.gmra.mxu3 %v227_v27 }
  0x94   :  { %v110_v33 = vpop.f32.mrf.mxu0  ;;  %v134_v36 = vpop.f32.mrf.mxu1 }
  0x95   :  { %v111_v40 = vadd.f32 %v110_v33, %v87_v37 }
  0x97   :  { %v135_v43 = vadd.f32 %v134_v36, %v111_v40 }
  0x9c   :  { %v158_v44 = vpop.f32.mrf.mxu0  ;;  %v180_v48 = vpop.f32.mrf.mxu1 }
  0x9d   :  { %v159_v49 = vadd.f32 %v158_v44, %v135_v43 }
  0x9f   :  { %v181_v50 = vadd.f32 %v180_v48, %v159_v49 }
  0xa1   :  { %561 = vperm.xlu0 %586, %v181_v50  }
  0xa9   :  { %587 = vset.pattern.permute.xlu0 %v589_v54 }
  0xaa   :  { %570 = vperm.xlu0 %587, %v181_v50  }
  0xce   :  { %v334_v56 = vpop.f32.mrf.mxu3 }
  0xd4   :  { %v392_v62 = vpop.f32.mrf.mxu0 }
  0xd5   :  { %v225_v55 = vpop.f32.mrf.mxu2  ;;  %v436_v8 = vpop.f32.mrf.mxu1 }
  0xd6   :  { %v335_v61 = vadd.f32 %v334_v56, %v225_v55  ;;  %v338_v0 = vpop.f32.mrf.mxu3 }
  0xd8   :  { %v393_v7 = vadd.f32 %v392_v62, %v335_v61 }
  0xda   :  { %v437_v12 = vadd.f32 %v436_v8, %v393_v7 }
  0xdc   :  { %v397_v25 = vpop.f32.mrf.mxu0 }
  0xdd   :  { %v233_v58 = vpop.f32.mrf.mxu2  ;;  %v442_v39 = vpop.f32.mrf.mxu1 }
  0xde   :  { %v339_v21 = vadd.f32 %v338_v0, %v233_v58 }
  0xe0   :  { %v398_v38 = vadd.f32 %v397_v25, %v339_v21 }
  0xe2   :  { %v443_v47 = vadd.f32 %v442_v39, %v398_v38 }
 0x107   :  { %v511_v18 = vpop.f32.mrf.mxu2 }
 0x108   :  { %v512_v32 = vadd.f32 %v511_v18, %v437_v12 }
 0x10e   :  { %v552_v29 = vpop.f32.mrf.mxu3 }
 0x10f   :  { %v553_v45 = vadd.f32 %v552_v29, %v512_v32  ;;  %v515_v53 = vpop.f32.mrf.mxu2 }
 0x110   :  { %v516_v63 = vadd.f32 %v515_v53, %v443_v47 }
 0x111   :  { %v566_v52 = vmul.f32 2.0, %v553_v45 }
 0x113   :  { %v562_v51 = vpop.permute.xlu0 %561 }
 0x114   :  { %v565_v57 = vadd.f32 %v564_v46, %v562_v51 }
 0x116   :  { %v567_v59 = vsub.f32 %v565_v57, %v566_v52  ;;  %v556_v60 = vpop.f32.mrf.mxu3 }
 0x117   :  { %v557_v1 = vadd.f32 %v556_v60, %v516_v63 }
 0x118   :  { %568 = vst [vmem:[%s940_s4] sm:$0xff] %v567_v59 }
 0x119   :  { %v575_v15 = vmul.f32 2.0, %v557_v1 }
 0x11c   :  { %v571_v9 = vpop.permute.xlu0 %570 }
 0x11d   :  { %v574_v16 = vadd.f32 %v573_v5, %v571_v9 }
 0x11f   :  { %v576_v24 = vsub.f32 %v574_v16, %v575_v15 }
 0x121   :  { %583 = vst [vmem:[%s940_s4 + $0x8] sm:$0xff] %v576_v24 }

// kernel: custom-call.12
= control target key start
LH: loop header
LB: loop body
LE: loop exit
PB: predicated region body
PF: predicated region fallthrough
CT: control target
= control target key end

     0   :  { %v35_v0 = vlaneseq  ;;  %v187_v18 = vmov -1.0   ;;  %s227_s0 = inlined_call_operand.vmem [shape: f32[1,6,6], index: 0, kind: input, shape index: {}]   ;;  %s228_s1 = inlined_call_operand.vmem [shape: f32[1,6,6], index: 1, kind: output, shape index: {}]  }
   0x1   :  { %v30_v1 = vld [vmem:[%s227_s0] sm:$0xff] }
   0x2   :  { %v201_v2 = vand.u32 127, %v35_v0  ;;  %v39_v3 = vshrl.u32 %v35_v0, 7 }
   0x4   :  { %vm41_vm0 = vcmp.eq.s32.totalorder %v39_v3, %v201_v2  ;;  %vm37_vm1 = vcmp.lt.s32.totalorder %v201_v2, 6  ;;  %vm46_vm2 = vcmp.le.s32.totalorder %v39_v3, %v201_v2  ;;  %vm73_vm8 = vcmp.eq.s32.totalorder %v201_v2, 5 }
   0x5   :  { %v43_v4 = vsel %vm41_vm0, %v30_v1, 0.0  ;;  %vm47_vm3 = vmand %vm46_vm2, %vm37_vm1  ;;  %vm70_vm9 = vcmp.eq.s32.totalorder %v201_v2, %v39_v3  ;;  %v74_v19 = vsel %vm73_vm8, 1.0, %v187_v18  ;;  %vm81_vm10 = vcmp.eq.s32.totalorder %v201_v2, 4 }
   0x6   :  { %44 = vadd.xlane.f32.xlu0 %v43_v4  ;;  %v48_v13 = vsel %vm47_vm3, %v30_v1, 0.0  ;;  %v75_v20 = vsel %vm70_vm9, %v74_v19, 0.0  ;;  %vm91_vm11 = vcmp.eq.s32.totalorder %v201_v2, 3  ;;  %vm101_vm12 = vcmp.eq.s32.totalorder %v201_v2, 2 }
   0x7   :  { %vm111_vm13 = vcmp.eq.s32.totalorder %v201_v2, 1  ;;  %vm120_vm14 = vcmp.eq.s32.totalorder %v201_v2, 0 }
  0x79   :  { %v204_v5 = vpop.xlane.xlu0 %44 }
  0x7a   :  { %185 = vrcp.f32 %v204_v5  ;;  %v60_v9 = vand.u32 2147483648, %v204_v5  ;;  %v58_v11 = vand.u32 2147483647, %v204_v5  ;;  %vm54_vm5 = vweird.f32 %v204_v5 }
  0x7c   :  { %v61_v14 = vor.u32 1.1754944e-38, %v60_v9  ;;  %vm59_vm7 = vcmp.eq.f32.partialorder %v58_v11, 8.507059e+37 }
  0x80   :  { %v186_v6 = vpop.eup %185 }
  0x81   :  { %v50_v7 = vmul.f32 %v186_v6, %v204_v5  ;;  %vm55_vm4 = vweird.f32 %v186_v6 }
  0x82   :  { %vm56_vm6 = vmor %vm54_vm5, %vm55_vm4 }
  0x83   :  { %v51_v8 = vsub.f32 1.0, %v50_v7 }
  0x85   :  { %v52_v10 = vmul.f32 %v186_v6, %v51_v8 }
  0x87   :  { %v53_v12 = vadd.f32 %v186_v6, %v52_v10 }
  0x89   :  { %v57_v15 = vsel %vm56_vm6, %v186_v6, %v53_v12 }
  0x8a   :  { %v62_v16 = vsel %vm59_vm7, %v61_v14, %v57_v15 }
  0x8b   :  { %v63_v17 = vmul.f32 %v62_v16, %v48_v13 }
  0x8d   :  { %64 = vst [vmem:[#allocation2] sm:$0xff] %v63_v17 }
  0x94   :  { %v77_v21 = vld [vmem:[#allocation2 + $0x4] ss:$0 sm:$0xff]  ;;  %v87_v24 = vld [vmem:[#allocation2 + $0x3] ss:$0 sm:$0xff]  ;;  %v97_v29 = vld [vmem:[#allocation2 + $0x2] ss:$0 sm:$0xff] }
  0x95   :  { %v78_v22 = vxor.u32 2147483648, %v77_v21  ;;  %v88_v26 = vxor.u32 2147483648, %v87_v24  ;;  %v98_v31 = vxor.u32 2147483648, %v97_v29  ;;  %v107_v34 = vld [vmem:[#allocation2 + $0x1] ss:$0 sm:$0xff] }
  0x96   :  { %v108_v36 = vxor.u32 2147483648, %v107_v34  ;;  %v116_v39 = vld [vmem:[#allocation2] ss:$0 sm:$0xff] }
  0x97   :  { %v82_v23 = vmul.f32 %v78_v22, %v75_v20  ;;  %v117_v41 = vxor.u32 2147483648, %v116_v39 }
  0x99   :  { %83 = vadd.xlane.f32.xlu0 %v82_v23 }
 0x10c   :  { %v84_v25 = vpop.xlane.xlu0 %83 }
 0x10d   :  { %v85_v27 = vsel %vm81_vm10, %v84_v25, %v75_v20 }
 0x10e   :  { %v92_v28 = vmul.f32 %v88_v26, %v85_v27 }
 0x110   :  { %93 = vadd.xlane.f32.xlu1 %v92_v28 }
 0x183   :  { %v94_v30 = vpop.xlane.xlu1 %93 }
 0x184   :  { %v95_v32 = vsel %vm91_vm11, %v94_v30, %v85_v27 }
 0x185   :  { %v102_v33 = vmul.f32 %v98_v31, %v95_v32 }
 0x187   :  { %103 = vadd.xlane.f32.xlu1 %v102_v33 }
 0x1fa   :  { %v104_v35 = vpop.xlane.xlu1 %103 }
 0x1fb   :  { %v105_v37 = vsel %vm101_vm12, %v104_v35, %v95_v32 }
 0x1fc   :  { %v112_v38 = vmul.f32 %v108_v36, %v105_v37 }
 0x1fe   :  { %113 = vadd.xlane.f32.xlu2 %v112_v38 }
 0x271   :  { %v114_v40 = vpop.xlane.xlu2 %113 }
 0x272   :  { %v115_v42 = vsel %vm111_vm13, %v114_v40, %v105_v37 }
 0x273   :  { %v121_v43 = vmul.f32 %v117_v41, %v115_v42 }
 0x275   :  { %122 = vadd.xlane.f32.xlu2 %v121_v43 }
 0x2e8   :  { %v123_v44 = vpop.xlane.xlu2 %122 }
 0x2e9   :  { %v124_v45 = vsel %vm120_vm14, %v123_v44, %v115_v42 }
 0x2ea   :  { %v139_v46 = vmul.f32 %v124_v45, %v62_v16 }
 0x2ec   :  { %v141_v47 = vsel %vm54_vm5, %v124_v45, %v139_v46 }
 0x2ed   :  { %172 = vst [vmem:[%s228_s1] sm:$0xff] %v141_v47 }

// kernel: random_walk_net_grp_forward.2
= control target key start
LH: loop header
LB: loop body
LE: loop exit
PB: predicated region body
PF: predicated region fallthrough
CT: control target
= control target key end

     0   :  { %s1231_s1 = inlined_call_operand.vmem [shape: bf16[1024,128], index: 1, kind: input, shape index: {}]   ;;  %s1232_s0 = inlined_call_operand.vmem [shape: f32[8,1024], index: 0, kind: input, shape index: {}]   ;;  %s1233_s2 = inlined_call_operand.vmem [shape: f32[1,128], index: 2, kind: input, shape index: {}]   ;;  %s1234_s3 = inlined_call_operand.vmem [shape: f32[8,128], index: 3, kind: output, shape index: {}]  }
   0x1   :  { %v931_v0 = vld [vmem:[%s1231_s1 + $0x38] sm:$0xff]  ;;  %v930_v4 = vld [vmem:[%s1231_s1 + $0x30] sm:$0xff]  ;;  %v929_v8 = vld [vmem:[%s1231_s1 + $0x28] sm:$0xff] }
   0x2   :  { %v939_v1 = vld [vmem:[%s1231_s1 + $0x78] sm:$0xff]  ;;  %548 = vmatpush.bf16.msra.mxu0 %v931_v0  ;;  %v938_v5 = vld [vmem:[%s1231_s1 + $0x70] sm:$0xff]  ;;  %v937_v9 = vld [vmem:[%s1231_s1 + $0x68] sm:$0xff] }
   0x3   :  { %v947_v2 = vld [vmem:[%s1231_s1 + $0xb8] sm:$0xff]  ;;  %561 = vmatpush.bf16.msra.mxu1 %v939_v1  ;;  %v946_v6 = vld [vmem:[%s1231_s1 + $0xb0] sm:$0xff]  ;;  %v945_v10 = vld [vmem:[%s1231_s1 + $0xa8] sm:$0xff] }
   0x4   :  { %v955_v3 = vld [vmem:[%s1231_s1 + $0xf8] sm:$0xff]  ;;  %574 = vmatpush.bf16.msra.mxu2 %v947_v2  ;;  %v954_v7 = vld [vmem:[%s1231_s1 + $0xf0] sm:$0xff]  ;;  %v953_v11 = vld [vmem:[%s1231_s1 + $0xe8] sm:$0xff] }
   0x5   :  { %587 = vmatpush.bf16.msra.mxu3 %v955_v3  ;;  %v928_v12 = vld [vmem:[%s1231_s1 + $0x20] sm:$0xff]  ;;  %v927_v16 = vld [vmem:[%s1231_s1 + $0x18] sm:$0xff]  ;;  %v926_v20 = vld [vmem:[%s1231_s1 + $0x10] sm:$0xff] }
   0x6   :  { %549 = vmatpush.bf16.msra.mxu0 %v930_v4  ;;  %v936_v13 = vld [vmem:[%s1231_s1 + $0x60] sm:$0xff]  ;;  %v935_v17 = vld [vmem:[%s1231_s1 + $0x58] sm:$0xff]  ;;  %v934_v21 = vld [vmem:[%s1231_s1 + $0x50] sm:$0xff] }
   0x7   :  { %562 = vmatpush.bf16.msra.mxu1 %v938_v5  ;;  %v944_v14 = vld [vmem:[%s1231_s1 + $0xa0] sm:$0xff]  ;;  %v943_v18 = vld [vmem:[%s1231_s1 + $0x98] sm:$0xff]  ;;  %v942_v22 = vld [vmem:[%s1231_s1 + $0x90] sm:$0xff] }
   0x8   :  { %575 = vmatpush.bf16.msra.mxu2 %v946_v6  ;;  %v952_v15 = vld [vmem:[%s1231_s1 + $0xe0] sm:$0xff]  ;;  %v951_v19 = vld [vmem:[%s1231_s1 + $0xd8] sm:$0xff]  ;;  %v950_v23 = vld [vmem:[%s1231_s1 + $0xd0] sm:$0xff] }
   0x9   :  { %588 = vmatpush.bf16.msra.mxu3 %v954_v7  ;;  %v925_v24 = vld [vmem:[%s1231_s1 + $0x8] sm:$0xff]  ;;  %v924_v28 = vld [vmem:[%s1231_s1] sm:$0xff]  ;;  %v963_v32 = vld [vmem:[%s1231_s1 + $0x138] sm:$0xff] }
   0xa   :  { %550 = vmatpush.bf16.msra.mxu0 %v929_v8  ;;  %v933_v25 = vld [vmem:[%s1231_s1 + $0x48] sm:$0xff]  ;;  %v932_v29 = vld [vmem:[%s1231_s1 + $0x40] sm:$0xff]  ;;  %v22_v33 = vld [vmem:[%s1232_s0 + $0x10] sm:$0xff] }
   0xb   :  { %563 = vmatpush.bf16.msra.mxu1 %v937_v9  ;;  %v941_v26 = vld [vmem:[%s1231_s1 + $0x88] sm:$0xff]  ;;  %v940_v30 = vld [vmem:[%s1231_s1 + $0x80] sm:$0xff]  ;;  %v23_v34 = vld [vmem:[%s1232_s0 + $0x18] sm:$0xff]  ;;  %v30_v40 = vpack.c.bf16 %v22_v33, %v22_v33 }
   0xc   :  { %576 = vmatpush.bf16.msra.mxu2 %v945_v10  ;;  %v949_v27 = vld [vmem:[%s1231_s1 + $0xc8] sm:$0xff]  ;;  %v948_v31 = vld [vmem:[%s1231_s1 + $0xc0] sm:$0xff]  ;;  %v971_v35 = vld [vmem:[%s1231_s1 + $0x178] sm:$0xff]  ;;  %v31_v41 = vpack.c.bf16 %v23_v34, %v23_v34 }
   0xd   :  { %589 = vmatpush.bf16.msra.mxu3 %v953_v11  ;;  %v20_v36 = vld [vmem:[%s1232_s0] sm:$0xff]  ;;  %v21_v37 = vld [vmem:[%s1232_s0 + $0x8] sm:$0xff]  ;;  %v979_v38 = vld [vmem:[%s1231_s1 + $0x1b8] sm:$0xff] }
   0xe   :  { %551 = vmatpush.bf16.msra.mxu0 %v928_v12  ;;  %v987_v39 = vld [vmem:[%s1231_s1 + $0x1f8] sm:$0xff]  ;;  %v28_v42 = vpack.c.bf16 %v20_v36, %v20_v36  ;;  %v29_v43 = vpack.c.bf16 %v21_v37, %v21_v37  ;;  %v962_v44 = vld [vmem:[%s1231_s1 + $0x130] sm:$0xff]  ;;  %v961_v48 = vld [vmem:[%s1231_s1 + $0x128] sm:$0xff] }
   0xf   :  { %564 = vmatpush.bf16.msra.mxu1 %v936_v13  ;;  %v970_v45 = vld [vmem:[%s1231_s1 + $0x170] sm:$0xff]  ;;  %v969_v49 = vld [vmem:[%s1231_s1 + $0x168] sm:$0xff]  ;;  %v960_v52 = vld [vmem:[%s1231_s1 + $0x120] sm:$0xff] }
  0x10   :  { %577 = vmatpush.bf16.msra.mxu2 %v944_v14  ;;  %v978_v46 = vld [vmem:[%s1231_s1 + $0x1b0] sm:$0xff]  ;;  %v977_v50 = vld [vmem:[%s1231_s1 + $0x1a8] sm:$0xff]  ;;  %v968_v53 = vld [vmem:[%s1231_s1 + $0x160] sm:$0xff] }
  0x11   :  { %590 = vmatpush.bf16.msra.mxu3 %v952_v15  ;;  %v986_v47 = vld [vmem:[%s1231_s1 + $0x1f0] sm:$0xff]  ;;  %v985_v51 = vld [vmem:[%s1231_s1 + $0x1e8] sm:$0xff]  ;;  %v976_v54 = vld [vmem:[%s1231_s1 + $0x1a0] sm:$0xff] }
  0x12   :  { %552 = vmatpush.bf16.msra.mxu0 %v927_v16  ;;  %v984_v55 = vld [vmem:[%s1231_s1 + $0x1e0] sm:$0xff]  ;;  %v959_v56 = vld [vmem:[%s1231_s1 + $0x118] sm:$0xff]  ;;  %v958_v60 = vld [vmem:[%s1231_s1 + $0x110] sm:$0xff] }
  0x13   :  { %565 = vmatpush.bf16.msra.mxu1 %v935_v17  ;;  %v967_v57 = vld [vmem:[%s1231_s1 + $0x158] sm:$0xff]  ;;  %v966_v61 = vld [vmem:[%s1231_s1 + $0x150] sm:$0xff]  ;;  %v957_v0 = vld [vmem:[%s1231_s1 + $0x108] sm:$0xff] }
  0x14   :  { %578 = vmatpush.bf16.msra.mxu2 %v943_v18  ;;  %v975_v58 = vld [vmem:[%s1231_s1 + $0x198] sm:$0xff]  ;;  %v974_v62 = vld [vmem:[%s1231_s1 + $0x190] sm:$0xff]  ;;  %v965_v1 = vld [vmem:[%s1231_s1 + $0x148] sm:$0xff] }
  0x15   :  { %591 = vmatpush.bf16.msra.mxu3 %v951_v19  ;;  %v983_v59 = vld [vmem:[%s1231_s1 + $0x1d8] sm:$0xff]  ;;  %v982_v63 = vld [vmem:[%s1231_s1 + $0x1d0] sm:$0xff]  ;;  %v973_v2 = vld [vmem:[%s1231_s1 + $0x188] sm:$0xff] }
  0x16   :  { %553 = vmatpush.bf16.msra.mxu0 %v926_v20  ;;  %v981_v3 = vld [vmem:[%s1231_s1 + $0x1c8] sm:$0xff]  ;;  %v956_v4 = vld [vmem:[%s1231_s1 + $0x100] sm:$0xff]  ;;  %v26_v10 = vld [vmem:[%s1232_s0 + $0x30] sm:$0xff] }
  0x17   :  { %566 = vmatpush.bf16.msra.mxu1 %v934_v21  ;;  %v964_v5 = vld [vmem:[%s1231_s1 + $0x140] sm:$0xff]  ;;  %v25_v8 = vld [vmem:[%s1232_s0 + $0x28] sm:$0xff]  ;;  %v27_v11 = vld [vmem:[%s1232_s0 + $0x38] sm:$0xff]  ;;  %v34_v14 = vpack.c.bf16 %v26_v10, %v26_v10 }
  0x18   :  { %579 = vmatpush.bf16.msra.mxu2 %v942_v22  ;;  %v972_v6 = vld [vmem:[%s1231_s1 + $0x180] sm:$0xff]  ;;  %v33_v13 = vpack.c.bf16 %v25_v8, %v25_v8  ;;  %v35_v15 = vpack.c.bf16 %v27_v11, %v27_v11 }
  0x19   :  { %592 = vmatpush.bf16.msra.mxu3 %v950_v23  ;;  %v24_v7 = vld [vmem:[%s1232_s0 + $0x20] sm:$0xff] }
  0x1a   :  { %554 = vmatpush.bf16.msra.mxu0 %v925_v24  ;;  %v980_v9 = vld [vmem:[%s1231_s1 + $0x1c0] sm:$0xff]  ;;  %v32_v12 = vpack.c.bf16 %v24_v7, %v24_v7 }
  0x1b   :  { %567 = vmatpush.bf16.msra.mxu1 %v933_v25  ;;  %v988_v34 = vld [vmem:[%s1233_s2] ss:$0 sm:$0xff] }
  0x1c   :  { %580 = vmatpush.bf16.msra.mxu2 %v941_v26 }
  0x1d   :  { %593 = vmatpush.bf16.msra.mxu3 %v949_v27 }
  0x1e   :  { %555 = vmatpush.bf16.msra.mxu0 %v924_v28 }
  0x1f   :  { %568 = vmatpush.bf16.msra.mxu1 %v932_v29 }
  0x20   :  { %581 = vmatpush.bf16.msra.mxu2 %v940_v30 }
  0x21   :  { %594 = vmatpush.bf16.msra.mxu3 %v948_v31  ;;  %556 = vmatmul.bf16.vlgmr.msra.gmra.mxu0 %v28_v42 }
  0x22   :  { %600 = vmatpush.bf16.msrb.mxu0 %v963_v32  ;;  %569 = vmatmul.bf16.vlgmr.msra.gmra.mxu1 %v29_v43 }
  0x23   :  { %613 = vmatpush.bf16.msrb.mxu1 %v971_v35  ;;  %582 = vmatmul.bf16.vlgmr.msra.gmra.mxu2 %v30_v40 }
  0x24   :  { %626 = vmatpush.bf16.msrb.mxu2 %v979_v38  ;;  %595 = vmatmul.bf16.vlgmr.msra.gmra.mxu3 %v31_v41 }
  0x25   :  { %639 = vmatpush.bf16.msrb.mxu3 %v987_v39 }
  0x26   :  { %601 = vmatpush.bf16.msrb.mxu0 %v962_v44 }
  0x27   :  { %614 = vmatpush.bf16.msrb.mxu1 %v970_v45 }
  0x28   :  { %627 = vmatpush.bf16.msrb.mxu2 %v978_v46 }
  0x29   :  { %640 = vmatpush.bf16.msrb.mxu3 %v986_v47 }
  0x2a   :  { %602 = vmatpush.bf16.msrb.mxu0 %v961_v48 }
  0x2b   :  { %615 = vmatpush.bf16.msrb.mxu1 %v969_v49 }
  0x2c   :  { %628 = vmatpush.bf16.msrb.mxu2 %v977_v50 }
  0x2d   :  { %641 = vmatpush.bf16.msrb.mxu3 %v985_v51 }
  0x2e   :  { %603 = vmatpush.bf16.msrb.mxu0 %v960_v52 }
  0x2f   :  { %616 = vmatpush.bf16.msrb.mxu1 %v968_v53 }
  0x30   :  { %629 = vmatpush.bf16.msrb.mxu2 %v976_v54 }
  0x31   :  { %642 = vmatpush.bf16.msrb.mxu3 %v984_v55 }
  0x32   :  { %604 = vmatpush.bf16.msrb.mxu0 %v959_v56 }
  0x33   :  { %617 = vmatpush.bf16.msrb.mxu1 %v967_v57 }
  0x34   :  { %630 = vmatpush.bf16.msrb.mxu2 %v975_v58 }
  0x35   :  { %643 = vmatpush.bf16.msrb.mxu3 %v983_v59 }
  0x36   :  { %605 = vmatpush.bf16.msrb.mxu0 %v958_v60 }
  0x37   :  { %618 = vmatpush.bf16.msrb.mxu1 %v966_v61 }
  0x38   :  { %631 = vmatpush.bf16.msrb.mxu2 %v974_v62 }
  0x39   :  { %644 = vmatpush.bf16.msrb.mxu3 %v982_v63 }
  0x3a   :  { %606 = vmatpush.bf16.msrb.mxu0 %v957_v0 }
  0x3b   :  { %619 = vmatpush.bf16.msrb.mxu1 %v965_v1 }
  0x3c   :  { %632 = vmatpush.bf16.msrb.mxu2 %v973_v2 }
  0x3d   :  { %645 = vmatpush.bf16.msrb.mxu3 %v981_v3 }
  0x3e   :  { %607 = vmatpush.bf16.msrb.mxu0 %v956_v4 }
  0x3f   :  { %620 = vmatpush.bf16.msrb.mxu1 %v964_v5 }
  0x40   :  { %633 = vmatpush.bf16.msrb.mxu2 %v972_v6 }
  0x41   :  { %646 = vmatpush.bf16.msrb.mxu3 %v980_v9  ;;  %608 = vmatmul.bf16.vlgmr.msrb.gmra.mxu0 %v32_v12 }
  0x42   :  { %621 = vmatmul.bf16.vlgmr.msrb.gmra.mxu1 %v33_v13 }
  0x43   :  { %634 = vmatmul.bf16.vlgmr.msrb.gmra.mxu2 %v34_v14 }
  0x44   :  { %647 = vmatmul.bf16.vlgmr.msrb.gmra.mxu3 %v35_v15 }
  0x9e   :  { %v557_v16 = vpop.f32.mrf.mxu0 }
  0x9f   :  { %v570_v17 = vpop.f32.mrf.mxu1 }
  0xa0   :  { %v571_v24 = vadd.f32 %v570_v17, %v557_v16 }
  0xa6   :  { %v583_v18 = vpop.f32.mrf.mxu2  ;;  %v559_v20 = vpop.f32.mrf.mxu0 }
  0xa7   :  { %v596_v19 = vpop.f32.mrf.mxu3  ;;  %v572_v21 = vpop.f32.mrf.mxu1  ;;  %v584_v25 = vadd.f32 %v583_v18, %v571_v24 }
  0xa9   :  { %v597_v26 = vadd.f32 %v596_v19, %v584_v25 }
  0xae   :  { %v585_v22 = vpop.f32.mrf.mxu2 }
  0xaf   :  { %v598_v23 = vpop.f32.mrf.mxu3 }
  0xbe   :  { %v609_v27 = vpop.f32.mrf.mxu0 }
  0xbf   :  { %v622_v28 = vpop.f32.mrf.mxu1  ;;  %v610_v29 = vadd.f32 %v609_v27, %v597_v26 }
  0xc1   :  { %v623_v30 = vadd.f32 %v622_v28, %v610_v29 }
  0xc6   :  { %v635_v31 = vpop.f32.mrf.mxu2  ;;  %v611_v35 = vpop.f32.mrf.mxu0 }
  0xc7   :  { %v648_v32 = vpop.f32.mrf.mxu3  ;;  %v636_v33 = vadd.f32 %v635_v31, %v623_v30  ;;  %v624_v36 = vpop.f32.mrf.mxu1 }
  0xc9   :  { %v649_v37 = vadd.f32 %v648_v32, %v636_v33 }
  0xcb   :  { %v662_v38 = vadd.f32 %v988_v34, %v649_v37 }
  0xcd   :  { %663 = vst [vmem:[%s1234_s3] sm:$0xff] %v662_v38 }
  0xce   :  { %v637_v39 = vpop.f32.mrf.mxu2 }
  0xcf   :  { %v650_v40 = vpop.f32.mrf.mxu3 }

</bundles_post_ra>
